<compile_context>
chip_gen: v6e
topology: v6e:2x2x1
jax: 0.10.0
libtpu: 0.0.40
codegen_flags: <defaults>
</compile_context>

<pallas_src>
import functools

import jax
import jax.numpy as jnp
from jax import lax
from jax.experimental import pallas as pl
from jax.experimental.pallas import tpu as pltpu


def _maunit_kernel(x_ref, R_ref, bias_ref, gfc1_ref, fc1b_ref, fc2t_ref,
                   tsp_ref, o_ref, pad_ref, *, cout):
    Bt, H, K = x_ref.shape
    WC = o_ref.shape[2]            # W * Cout (lane-dense, channel-minor layout)
    M = Bt * H

    # ---- conv3x3 + conv5x5 + 1x1 skip: one im2row MXU matmul ----------------
    lhs = x_ref[...].reshape(M, K)
    acc = jnp.dot(lhs, R_ref[...],
                  preferred_element_type=jnp.float32) + bias_ref[...]
    conv3 = acc[:, 0:WC]
    conv5 = acc[:, WC:2 * WC]
    resid = acc[:, 2 * WC:3 * WC]

    # ---- channel attention (SK selection); BN + 1/(H*W) GAP folded in -------
    csum = jnp.sum((conv3 + conv5).reshape(Bt, H, WC), axis=1)       # (Bt, WC)
    h1 = jnp.maximum(
        jnp.dot(csum, gfc1_ref[...], preferred_element_type=jnp.float32)
        + fc1b_ref[...], 0.0)                                        # (Bt, mid)
    att = jnp.dot(h1, fc2t_ref[...], preferred_element_type=jnp.float32)
    a0 = att[:, 0:WC]
    a1 = att[:, WC:2 * WC]
    mm = jnp.maximum(a0, a1)
    e0 = jnp.exp(a0 - mm)
    e1 = jnp.exp(a1 - mm)
    inv = 1.0 / (e0 + e1)          # exact (keeps parity with the reference)
    w0 = (e0 * inv).reshape(Bt, 1, WC)
    w1 = (e1 * inv).reshape(Bt, 1, WC)
    out3 = conv3.reshape(Bt, H, WC) * w0 + conv5.reshape(Bt, H, WC) * w1
    out = out3.reshape(M, WC)

    # ---- channel-group max: log2(Cout) roll+max steps on the lane axis ------
    # group max lands in the last lane of each Cout group; other lanes (and
    # wrapped lanes near index 0) are masked out by the Toeplitz cmask.
    mx = out
    s = 1
    while s < cout:
        mx = jnp.maximum(mx, pltpu.roll(mx, shift=s, axis=1))
        s *= 2

    # ---- spatial attention (CBAM 7x7) as Toeplitz matmuls -------------------
    zhalo = jnp.zeros((Bt, 3, 2 * WC), jnp.float32)
    pad_ref[:, 0:3, :] = zhalo                      # top halo rows
    pad_ref[:, 3 + H:6 + H, :] = zhalo              # bottom halo rows
    pad_ref[:, 3:3 + H, 0:WC] = out3
    pad_ref[:, 3:3 + H, WC:2 * WC] = mx.reshape(Bt, H, WC)

    sp = jnp.zeros((M, WC), jnp.float32)
    for kh in range(7):
        win = pad_ref[:, kh:kh + H, :].reshape(M, 2 * WC)
        sp = sp + jnp.dot(win, tsp_ref[kh],
                          preferred_element_type=jnp.float32)        # (M, WC)
    sa = 1.0 / (1.0 + jnp.exp(-sp))

    # ---- gate, residual add, ReLU (lane-dense store) -------------------------
    o_ref[...] = jnp.maximum(out * sa + resid, 0.0).reshape(Bt, H, WC)


def _pick_bt(B, H, max_rows=128):
    """Batch tile: fold batch into the matmul M axis (target M<=max_rows),
    while keeping >= 2 grid steps when B >= 2 (so both v7x TCs get work)."""
    best = 1
    for d in range(1, B + 1):
        if B % d == 0 and d * H <= max_rows and (B // d >= 2 or B == 1):
            best = d
    return best


def prepare_maunit(p, H, W, eps=1e-5):
    """Precompute all weight-derived kernel operands (hoisted out of the
    per-call path; recompute only when the weights change)."""
    f32 = jnp.float32
    Cout, Cin = p['w3'].shape[0], p['w3'].shape[1]
    mid = p['fc1'].shape[0]
    WC = W * Cout
    HW = H * W
    Wp4 = W + 4
    assert Cout >= 2 and (Cout & (Cout - 1)) == 0, "Cout must be a power of 2"
    assert Cin != Cout, "identity-skip branch (Cin == Cout) not implemented"

    # folded BatchNorm affines (inference mode)
    bn_s = p['bn_gamma'] / jnp.sqrt(p['bn_var'] + eps)
    bn_b = p['bn_beta'] - p['bn_mean'] * bn_s
    sk_s = p['skip_gamma'] / jnp.sqrt(p['skip_var'] + eps)
    sk_b = p['skip_beta'] - p['skip_mean'] * sk_s

    # combined 5x5-support weights, output columns = [conv3 | conv5 | skip]
    w3 = jnp.transpose(p['w3'], (2, 3, 1, 0))                        # (3,3,Cin,Cout)
    w5 = jnp.transpose(p['w5'], (2, 3, 1, 0))                        # (5,5,Cin,Cout)
    wsk = jnp.transpose(p['w_skip'][:, :, 0, 0]) * sk_s[None, :]     # (Cin,Cout)
    W_all = jnp.zeros((5, 5, Cin, 3 * Cout), f32)
    W_all = W_all.at[1:4, 1:4, :, 0:Cout].set(w3)
    W_all = W_all.at[:, :, :, Cout:2 * Cout].set(w5)
    W_all = W_all.at[2, 2, :, 2 * Cout:].set(wsk)

    # im2row conv matrix R: (5*(W+4)*Cin, 3*W*Cout), kh-major rows
    wp = jnp.arange(Wp4)
    wo = jnp.arange(W)
    kw = wp[:, None] - wo[None, :]                                   # (Wp4, W)
    kval = ((kw >= 0) & (kw < 5)).astype(f32)
    kwc = jnp.clip(kw, 0, 4)
    g = W_all[:, kwc] * kval[None, :, :, None, None]                 # (5,Wp4,W,Cin,3C)
    g = g.reshape(5, Wp4, W, Cin, 3, Cout)
    g = jnp.transpose(g, (0, 1, 3, 4, 2, 5))                         # (5,Wp4,Cin,3,W,Cout)
    R = g.reshape(5 * Wp4 * Cin, 3 * WC)

    # per-column bias, tiled over W: [b3 | b5 | skip-BN shift]
    bias_g = jnp.stack([p['b3'], p['b5'], sk_b], axis=0)             # (3, Cout)
    bias_t = jnp.tile(bias_g[:, None, :], (1, W, 1)).reshape(1, 3 * WC)

    # channel attention: fold BN affine and 1/(H*W) GAP into fc1
    fc1 = jnp.transpose(p['fc1'][:, :, 0, 0])                        # (Cout, mid)
    fc2 = jnp.transpose(p['fc2'][:, :, 0, 0])                        # (mid, 2*Cout)
    gfc1 = jnp.tile(fc1 * bn_s[:, None] / HW, (W, 1))                # (WC, mid)
    fc1b = bn_b[None, :] @ fc1                                       # (1, mid)
    fc2t = jnp.tile(fc2.reshape(mid, 2, 1, Cout),
                    (1, 1, W, 1)).reshape(mid, 2 * WC)               # (mid, 2*WC)

    # CBAM 7x7 conv as Toeplitz; channel-mean folded, channel-max picks the
    # LAST lane of each Cout group (where the roll-max tree leaves it)
    Ka = p['w_sp'][0, 0]                                             # (7,7) mean map
    Km = p['w_sp'][0, 1]                                             # (7,7) max map
    dif = wo[:, None] - wo[None, :] + 3                              # (W_in, W_out)
    sval = ((dif >= 0) & (dif <= 6)).astype(f32)
    difc = jnp.clip(dif, 0, 6)
    Ta = Ka[:, difc] * sval[None]                                    # (7, W, W)
    Tm = Km[:, difc] * sval[None]
    Ta_full = jnp.broadcast_to(Ta[:, :, None, :] / Cout,
                               (7, W, Cout, W)).reshape(7, WC, W)
    cmask = (jnp.arange(Cout) == Cout - 1).astype(f32)
    Tm_full = (Tm[:, :, None, :] * cmask[None, None, :, None]).reshape(7, WC, W)
    tsp = jnp.concatenate([Ta_full, Tm_full], axis=1)                # (7, 2*WC, W)
    # fold the (W -> W*Cout) gate replication into the Toeplitz (lane-dense N)
    tsp = jnp.repeat(tsp, Cout, axis=2)                              # (7, 2*WC, WC)

    return {
        'R': R, 'bias': bias_t, 'gfc1': gfc1, 'fc1b': fc1b, 'fc2t': fc2t,
        'tsp': tsp, 'dims': (Cin, Cout, H, W, mid),
    }


def maunit_pallas(x_nchw, prep):
    """MAUnit forward. x_nchw: (B, Cin, H, W) float32 -> (B, Cout, H, W)."""
    Cin, Cout, H, W, mid = prep['dims']
    WC = W * Cout
    Wp4 = W + 4
    K = 5 * Wp4 * Cin
    f32 = jnp.float32

    x = jnp.transpose(x_nchw, (0, 2, 3, 1)).astype(f32)              # NHWC
    B = x.shape[0]
    assert x.shape == (B, H, W, Cin)

    # input rows padded by 2 (5x5 support); pre-im2row the 5 row shifts onto
    # the lane axis so the kernel does a single aligned MXU matmul.
    xp = jnp.pad(x, ((0, 0), (2, 2), (2, 2), (0, 0)))
    xrow = xp.reshape(B, H + 4, Wp4 * Cin)
    xim = jnp.concatenate([xrow[:, kh:kh + H, :] for kh in range(5)], axis=-1)

    Bt = _pick_bt(B, H)
    grid = (B // Bt,)

    kernel = functools.partial(_maunit_kernel, cout=Cout)
    out = pl.pallas_call(
        kernel,
        out_shape=jax.ShapeDtypeStruct((B, H, WC), f32),
        grid_spec=pltpu.PrefetchScalarGridSpec(
            num_scalar_prefetch=0,
            grid=grid,
            in_specs=[
                pl.BlockSpec((Bt, H, K), lambda b: (b, 0, 0)),
                pl.BlockSpec((K, 3 * WC), lambda b: (0, 0)),
                pl.BlockSpec((1, 3 * WC), lambda b: (0, 0)),
                pl.BlockSpec((WC, mid), lambda b: (0, 0)),
                pl.BlockSpec((1, mid), lambda b: (0, 0)),
                pl.BlockSpec((mid, 2 * WC), lambda b: (0, 0)),
                pl.BlockSpec((7, 2 * WC, WC), lambda b: (0, 0, 0)),
            ],
            out_specs=pl.BlockSpec((Bt, H, WC), lambda b: (b, 0, 0)),
            scratch_shapes=[pltpu.VMEM((Bt, H + 6, 2 * WC), f32)],
        ),
        compiler_params=pltpu.CompilerParams(
            dimension_semantics=("parallel",)),
    )(xim, prep['R'], prep['bias'], prep['gfc1'], prep['fc1b'],
      prep['fc2t'], prep['tsp'])

    out = out.reshape(B, H, W, Cout)
    return jnp.transpose(out, (0, 3, 1, 2))                          # back to NCHW


# ----------------------------- parameter init ---------------------------------
def init_params(key, cin, cout, reduction_ratio=16, L=32):
    mid = max(cout // reduction_ratio, L)
    ks = jax.random.split(key, 12)

    def u(k, shape, scale):
        return jax.random.uniform(k, shape, jnp.float32, -1.0, 1.0) * scale

    return {
        'w3': u(ks[0], (cout, cin, 3, 3), 0.2),
        'b3': u(ks[1], (cout,), 0.1),
        'w5': u(ks[2], (cout, cin, 5, 5), 0.1),
        'b5': u(ks[3], (cout,), 0.1),
        'bn_gamma': 1.0 + u(ks[4], (cout,), 0.1),
        'bn_beta': u(ks[5], (cout,), 0.1),
        'bn_mean': u(ks[6], (cout,), 0.1),
        'bn_var': 1.0 + jnp.abs(u(ks[7], (cout,), 0.1)),
        'fc1': u(ks[8], (mid, cout, 1, 1), 0.2),
        'fc2': u(ks[9], (2 * cout, mid, 1, 1), 0.2),
        'w_sp': u(ks[10], (1, 2, 7, 7), 0.2),
        'w_skip': u(ks[11], (cout, cin, 1, 1), 0.3),
        'skip_gamma': jnp.ones((cout,), jnp.float32),
        'skip_beta': jnp.zeros((cout,), jnp.float32),
        'skip_mean': jnp.zeros((cout,), jnp.float32),
        'skip_var': jnp.ones((cout,), jnp.float32),
    }


# ----------------------------- pure-JAX reference ------------------------------
def maunit_reference(x, p, eps=1e-5):
    dn = ('NCHW', 'OIHW', 'NCHW')
    hi = lax.Precision.HIGHEST

    def bcast(v):
        return v.reshape(1, -1, 1, 1)

    conv3 = lax.conv_general_dilated(x, p['w3'], (1, 1), 'SAME',
                                     dimension_numbers=dn, precision=hi) + bcast(p['b3'])
    conv5 = lax.conv_general_dilated(x, p['w5'], (1, 1), 'SAME',
                                     dimension_numbers=dn, precision=hi) + bcast(p['b5'])
    fused = conv3 + conv5
    fused = (fused - bcast(p['bn_mean'])) / jnp.sqrt(bcast(p['bn_var']) + eps) \
            * bcast(p['bn_gamma']) + bcast(p['bn_beta'])

    gap = jnp.mean(fused, axis=(2, 3))                               # (B, C)
    h1 = jnp.maximum(jnp.dot(gap, p['fc1'][:, :, 0, 0].T, precision=hi), 0.0)
    att = jnp.dot(h1, p['fc2'][:, :, 0, 0].T, precision=hi)          # (B, 2C)
    B, C = gap.shape
    att = jax.nn.softmax(att.reshape(B, 2, C), axis=1)
    out = conv3 * att[:, 0][:, :, None, None] + conv5 * att[:, 1][:, :, None, None]

    avg = jnp.mean(out, axis=1, keepdims=True)
    mx = jnp.max(out, axis=1, keepdims=True)
    cat = jnp.concatenate([avg, mx], axis=1)
    sp = lax.conv_general_dilated(cat, p['w_sp'], (1, 1), 'SAME',
                                  dimension_numbers=dn, precision=hi)
    out = out * jax.nn.sigmoid(sp)

    res = lax.conv_general_dilated(x, p['w_skip'], (1, 1), 'SAME',
                                   dimension_numbers=dn, precision=hi)
    res = (res - bcast(p['skip_mean'])) / jnp.sqrt(bcast(p['skip_var']) + eps) \
          * bcast(p['skip_gamma']) + bcast(p['skip_beta'])
    return jnp.maximum(out + res, 0.0)


if __name__ == "__main__":
    key = jax.random.PRNGKey(0)
    kx, kp = jax.random.split(key)

    B, Cin, Cout, H, W = 2, 4, 8, 16, 16
    x = jax.random.normal(kx, (B, Cin, H, W), jnp.float32)
    params = init_params(kp, Cin, Cout)

    prep = prepare_maunit(params, H, W)      # hoisted weight preprocessing
    out = maunit_pallas(x, prep)
    out = jax.block_until_ready(out)
    assert out.shape == (B, Cout, H, W)

    ref = maunit_reference(x, params)
    err = float(jnp.max(jnp.abs(out - ref)))
    if err < 2e-3:
        print("KERNEL_OK")
    else:
        print("max abs err:", err)
</pallas_src>

<mosaic_0001>
module attributes {stable_mosaic.version = 11 : i64} {
  func.func @_maunit_kernel(%arg0: i32, %arg1: memref<1x16x400xf32, #tpu.memory_space<vmem>>, %arg2: memref<400x384xf32, #tpu.memory_space<vmem>>, %arg3: memref<1x384xf32, #tpu.memory_space<vmem>>, %arg4: memref<128x32xf32, #tpu.memory_space<vmem>>, %arg5: memref<1x32xf32, #tpu.memory_space<vmem>>, %arg6: memref<32x256xf32, #tpu.memory_space<vmem>>, %arg7: memref<7x256x128xf32, #tpu.memory_space<vmem>>, %arg8: memref<1x16x128xf32, #tpu.memory_space<vmem>>, %arg9: memref<1x22x256xf32, #tpu.memory_space<vmem>>) attributes {dimension_semantics = [#tpu.dimension_semantics<parallel>], iteration_bounds = array<i64: 2>, scalar_prefetch = 0 : i64, scratch_operands = 1 : i64, tpu.core_type = #tpu.core_type<tc>, window_params = [{transform_indices = @transform_0, window_bounds = array<i64: 1, 16, 400>}, {pipeline_mode = #tpu.pipeline_mode<synchronous>, transform_indices = @transform_1, window_bounds = array<i64: 400, 384>}, {pipeline_mode = #tpu.pipeline_mode<synchronous>, transform_indices = @transform_2, window_bounds = array<i64: 1, 384>}, {pipeline_mode = #tpu.pipeline_mode<synchronous>, transform_indices = @transform_3, window_bounds = array<i64: 128, 32>}, {pipeline_mode = #tpu.pipeline_mode<synchronous>, transform_indices = @transform_4, window_bounds = array<i64: 1, 32>}, {pipeline_mode = #tpu.pipeline_mode<synchronous>, transform_indices = @transform_5, window_bounds = array<i64: 32, 256>}, {pipeline_mode = #tpu.pipeline_mode<synchronous>, transform_indices = @transform_6, window_bounds = array<i64: 7, 256, 128>}, {transform_indices = @transform_7, window_bounds = array<i64: 1, 16, 128>}]} {
    %c0 = arith.constant 0 : index
    %c0_0 = arith.constant 0 : index
    %c0_1 = arith.constant 0 : index
    %0 = vector.load %arg1[%c0, %c0_0, %c0_1] : memref<1x16x400xf32, #tpu.memory_space<vmem>>, vector<1x16x400xf32>
    %1 = vector.shape_cast %0 : vector<1x16x400xf32> to vector<16x400xf32>
    %c0_2 = arith.constant 0 : index
    %c0_3 = arith.constant 0 : index
    %2 = vector.load %arg2[%c0_2, %c0_3] : memref<400x384xf32, #tpu.memory_space<vmem>>, vector<400x384xf32>
    %cst = arith.constant dense<0.000000e+00> : vector<16x384xf32>
    %3 = tpu.matmul %1, %2, %cst {dimension_numbers = #tpu.dot_dimension_numbers<[1], [0], [0], [1], [0, 0, 1, 1], [], []>} : vector<16x400xf32>, vector<400x384xf32>, vector<16x384xf32> -> vector<16x384xf32>
    %c0_4 = arith.constant 0 : index
    %c0_5 = arith.constant 0 : index
    %4 = vector.load %arg3[%c0_4, %c0_5] : memref<1x384xf32, #tpu.memory_space<vmem>>, vector<1x384xf32>
    %5 = vector.broadcast %4 : vector<1x384xf32> to vector<16x384xf32>
    %6 = arith.addf %3, %5 : vector<16x384xf32>
    %7 = vector.extract_strided_slice %6 {offsets = [0, 0], sizes = [16, 128], strides = [1, 1]} : vector<16x384xf32> to vector<16x128xf32>
    %8 = vector.extract_strided_slice %6 {offsets = [0, 128], sizes = [16, 128], strides = [1, 1]} : vector<16x384xf32> to vector<16x128xf32>
    %9 = vector.extract_strided_slice %6 {offsets = [0, 256], sizes = [16, 128], strides = [1, 1]} : vector<16x384xf32> to vector<16x128xf32>
    %10 = arith.addf %7, %8 : vector<16x128xf32>
    %11 = vector.shape_cast %10 : vector<16x128xf32> to vector<1x16x128xf32>
    %cst_6 = arith.constant dense<0.000000e+00> : vector<1x128xf32>
    %12 = vector.multi_reduction <add>, %11, %cst_6 [1] : vector<1x16x128xf32> to vector<1x128xf32>
    %c0_7 = arith.constant 0 : index
    %c0_8 = arith.constant 0 : index
    %13 = vector.load %arg4[%c0_7, %c0_8] : memref<128x32xf32, #tpu.memory_space<vmem>>, vector<128x32xf32>
    %cst_9 = arith.constant dense<0.000000e+00> : vector<1x32xf32>
    %14 = tpu.matmul %12, %13, %cst_9 {dimension_numbers = #tpu.dot_dimension_numbers<[1], [0], [0], [1], [0, 0, 1, 1], [], []>} : vector<1x128xf32>, vector<128x32xf32>, vector<1x32xf32> -> vector<1x32xf32>
    %c0_10 = arith.constant 0 : index
    %c0_11 = arith.constant 0 : index
    %15 = vector.load %arg5[%c0_10, %c0_11] : memref<1x32xf32, #tpu.memory_space<vmem>>, vector<1x32xf32>
    %16 = arith.addf %14, %15 : vector<1x32xf32>
    %cst_12 = arith.constant 0.000000e+00 : f32
    %17 = vector.broadcast %cst_12 : f32 to vector<1x32xf32>
    %18 = arith.maximumf %16, %17 : vector<1x32xf32>
    %c0_13 = arith.constant 0 : index
    %c0_14 = arith.constant 0 : index
    %19 = vector.load %arg6[%c0_13, %c0_14] : memref<32x256xf32, #tpu.memory_space<vmem>>, vector<32x256xf32>
    %cst_15 = arith.constant dense<0.000000e+00> : vector<1x256xf32>
    %20 = tpu.matmul %18, %19, %cst_15 {dimension_numbers = #tpu.dot_dimension_numbers<[1], [0], [0], [1], [0, 0, 1, 1], [], []>} : vector<1x32xf32>, vector<32x256xf32>, vector<1x256xf32> -> vector<1x256xf32>
    %21 = vector.extract_strided_slice %20 {offsets = [0, 0], sizes = [1, 128], strides = [1, 1]} : vector<1x256xf32> to vector<1x128xf32>
    %22 = vector.extract_strided_slice %20 {offsets = [0, 128], sizes = [1, 128], strides = [1, 1]} : vector<1x256xf32> to vector<1x128xf32>
    %23 = arith.maximumf %21, %22 : vector<1x128xf32>
    %24 = arith.subf %21, %23 : vector<1x128xf32>
    %25 = math.exp %24 : vector<1x128xf32>
    %26 = arith.subf %22, %23 : vector<1x128xf32>
    %27 = math.exp %26 : vector<1x128xf32>
    %28 = arith.addf %25, %27 : vector<1x128xf32>
    %cst_16 = arith.constant 1.000000e+00 : f32
    %29 = vector.broadcast %cst_16 : f32 to vector<1x128xf32>
    %30 = arith.divf %29, %28 : vector<1x128xf32>
    %31 = arith.mulf %25, %30 : vector<1x128xf32>
    %32 = vector.shape_cast %31 : vector<1x128xf32> to vector<1x1x128xf32>
    %33 = arith.mulf %27, %30 : vector<1x128xf32>
    %34 = vector.shape_cast %33 : vector<1x128xf32> to vector<1x1x128xf32>
    %35 = vector.shape_cast %7 : vector<16x128xf32> to vector<1x16x128xf32>
    %36 = vector.broadcast %32 : vector<1x1x128xf32> to vector<1x16x128xf32>
    %37 = arith.mulf %35, %36 : vector<1x16x128xf32>
    %38 = vector.shape_cast %8 : vector<16x128xf32> to vector<1x16x128xf32>
    %39 = vector.broadcast %34 : vector<1x1x128xf32> to vector<1x16x128xf32>
    %40 = arith.mulf %38, %39 : vector<1x16x128xf32>
    %41 = arith.addf %37, %40 : vector<1x16x128xf32>
    %42 = vector.shape_cast %41 : vector<1x16x128xf32> to vector<16x128xf32>
    %c1_i32 = arith.constant 1 : i32
    %43 = tpu.dynamic_rotate %42 by %c1_i32 dim 1 : vector<16x128xf32>, i32 -> vector<16x128xf32>
    %44 = arith.maximumf %42, %43 : vector<16x128xf32>
    %c2_i32 = arith.constant 2 : i32
    %45 = tpu.dynamic_rotate %44 by %c2_i32 dim 1 : vector<16x128xf32>, i32 -> vector<16x128xf32>
    %46 = arith.maximumf %44, %45 : vector<16x128xf32>
    %c4_i32 = arith.constant 4 : i32
    %47 = tpu.dynamic_rotate %46 by %c4_i32 dim 1 : vector<16x128xf32>, i32 -> vector<16x128xf32>
    %48 = arith.maximumf %46, %47 : vector<16x128xf32>
    %cst_17 = arith.constant 0.000000e+00 : f32
    %49 = vector.broadcast %cst_17 : f32 to vector<1x3x256xf32>
    %c0_18 = arith.constant 0 : index
    %c0_19 = arith.constant 0 : index
    %c0_20 = arith.constant 0 : index
    %50 = vector.load %arg9[%c0_18, %c0_19, %c0_20] : memref<1x22x256xf32, #tpu.memory_space<vmem>>, vector<1x3x256xf32>
    tpu.vector_store %arg9[%c0_18, %c0_19, %c0_20], %49 {strides = array<i32>} : memref<1x22x256xf32, #tpu.memory_space<vmem>>, vector<1x3x256xf32>,
    %c0_21 = arith.constant 0 : index
    %c19 = arith.constant 19 : index
    %c0_22 = arith.constant 0 : index
    %51 = vector.load %arg9[%c0_21, %c19, %c0_22] : memref<1x22x256xf32, #tpu.memory_space<vmem>>, vector<1x3x256xf32>
    tpu.vector_store %arg9[%c0_21, %c19, %c0_22], %49 {strides = array<i32>} : memref<1x22x256xf32, #tpu.memory_space<vmem>>, vector<1x3x256xf32>,
    %c0_23 = arith.constant 0 : index
    %c3 = arith.constant 3 : index
    %c0_24 = arith.constant 0 : index
    %52 = vector.load %arg9[%c0_23, %c3, %c0_24] : memref<1x22x256xf32, #tpu.memory_space<vmem>>, vector<1x16x128xf32>
    tpu.vector_store %arg9[%c0_23, %c3, %c0_24], %41 {strides = array<i32>} : memref<1x22x256xf32, #tpu.memory_space<vmem>>, vector<1x16x128xf32>,
    %53 = vector.shape_cast %48 : vector<16x128xf32> to vector<1x16x128xf32>
    %c0_25 = arith.constant 0 : index
    %c3_26 = arith.constant 3 : index
    %c128 = arith.constant 128 : index
    %54 = vector.load %arg9[%c0_25, %c3_26, %c128] : memref<1x22x256xf32, #tpu.memory_space<vmem>>, vector<1x16x128xf32>
    tpu.vector_store %arg9[%c0_25, %c3_26, %c128], %53 {strides = array<i32>} : memref<1x22x256xf32, #tpu.memory_space<vmem>>, vector<1x16x128xf32>,
    %cst_27 = arith.constant 0.000000e+00 : f32
    %55 = vector.broadcast %cst_27 : f32 to vector<16x128xf32>
    %c0_28 = arith.constant 0 : index
    %c0_29 = arith.constant 0 : index
    %c0_30 = arith.constant 0 : index
    %56 = vector.load %arg9[%c0_28, %c0_29, %c0_30] : memref<1x22x256xf32, #tpu.memory_space<vmem>>, vector<1x16x256xf32>
    %57 = vector.shape_cast %56 : vector<1x16x256xf32> to vector<16x256xf32>
    %c0_31 = arith.constant 0 : index
    %c0_32 = arith.constant 0 : index
    %c0_33 = arith.constant 0 : index
    %58 = vector.load %arg7[%c0_31, %c0_32, %c0_33] : memref<7x256x128xf32, #tpu.memory_space<vmem>>, vector<1x256x128xf32>
    %59 = vector.shape_cast %58 : vector<1x256x128xf32> to vector<256x128xf32>
    %cst_34 = arith.constant dense<0.000000e+00> : vector<16x128xf32>
    %60 = tpu.matmul %57, %59, %cst_34 {dimension_numbers = #tpu.dot_dimension_numbers<[1], [0], [0], [1], [0, 0, 1, 1], [], []>} : vector<16x256xf32>, vector<256x128xf32>, vector<16x128xf32> -> vector<16x128xf32>
    %61 = arith.addf %55, %60 : vector<16x128xf32>
    %c0_35 = arith.constant 0 : index
    %c1 = arith.constant 1 : index
    %c0_36 = arith.constant 0 : index
    %62 = vector.load %arg9[%c0_35, %c1, %c0_36] : memref<1x22x256xf32, #tpu.memory_space<vmem>>, vector<1x16x256xf32>
    %63 = vector.shape_cast %62 : vector<1x16x256xf32> to vector<16x256xf32>
    %c1_37 = arith.constant 1 : index
    %c0_38 = arith.constant 0 : index
    %c0_39 = arith.constant 0 : index
    %64 = vector.load %arg7[%c1_37, %c0_38, %c0_39] : memref<7x256x128xf32, #tpu.memory_space<vmem>>, vector<1x256x128xf32>
    %65 = vector.shape_cast %64 : vector<1x256x128xf32> to vector<256x128xf32>
    %cst_40 = arith.constant dense<0.000000e+00> : vector<16x128xf32>
    %66 = tpu.matmul %63, %65, %cst_40 {dimension_numbers = #tpu.dot_dimension_numbers<[1], [0], [0], [1], [0, 0, 1, 1], [], []>} : vector<16x256xf32>, vector<256x128xf32>, vector<16x128xf32> -> vector<16x128xf32>
    %67 = arith.addf %61, %66 : vector<16x128xf32>
    %c0_41 = arith.constant 0 : index
    %c2 = arith.constant 2 : index
    %c0_42 = arith.constant 0 : index
    %68 = vector.load %arg9[%c0_41, %c2, %c0_42] : memref<1x22x256xf32, #tpu.memory_space<vmem>>, vector<1x16x256xf32>
    %69 = vector.shape_cast %68 : vector<1x16x256xf32> to vector<16x256xf32>
    %c2_43 = arith.constant 2 : index
    %c0_44 = arith.constant 0 : index
    %c0_45 = arith.constant 0 : index
    %70 = vector.load %arg7[%c2_43, %c0_44, %c0_45] : memref<7x256x128xf32, #tpu.memory_space<vmem>>, vector<1x256x128xf32>
    %71 = vector.shape_cast %70 : vector<1x256x128xf32> to vector<256x128xf32>
    %cst_46 = arith.constant dense<0.000000e+00> : vector<16x128xf32>
    %72 = tpu.matmul %69, %71, %cst_46 {dimension_numbers = #tpu.dot_dimension_numbers<[1], [0], [0], [1], [0, 0, 1, 1], [], []>} : vector<16x256xf32>, vector<256x128xf32>, vector<16x128xf32> -> vector<16x128xf32>
    %73 = arith.addf %67, %72 : vector<16x128xf32>
    %c0_47 = arith.constant 0 : index
    %c3_48 = arith.constant 3 : index
    %c0_49 = arith.constant 0 : index
    %74 = vector.load %arg9[%c0_47, %c3_48, %c0_49] : memref<1x22x256xf32, #tpu.memory_space<vmem>>, vector<1x16x256xf32>
    %75 = vector.shape_cast %74 : vector<1x16x256xf32> to vector<16x256xf32>
    %c3_50 = arith.constant 3 : index
    %c0_51 = arith.constant 0 : index
    %c0_52 = arith.constant 0 : index
    %76 = vector.load %arg7[%c3_50, %c0_51, %c0_52] : memref<7x256x128xf32, #tpu.memory_space<vmem>>, vector<1x256x128xf32>
    %77 = vector.shape_cast %76 : vector<1x256x128xf32> to vector<256x128xf32>
    %cst_53 = arith.constant dense<0.000000e+00> : vector<16x128xf32>
    %78 = tpu.matmul %75, %77, %cst_53 {dimension_numbers = #tpu.dot_dimension_numbers<[1], [0], [0], [1], [0, 0, 1, 1], [], []>} : vector<16x256xf32>, vector<256x128xf32>, vector<16x128xf32> -> vector<16x128xf32>
    %79 = arith.addf %73, %78 : vector<16x128xf32>
    %c0_54 = arith.constant 0 : index
    %c4 = arith.constant 4 : index
    %c0_55 = arith.constant 0 : index
    %80 = vector.load %arg9[%c0_54, %c4, %c0_55] : memref<1x22x256xf32, #tpu.memory_space<vmem>>, vector<1x16x256xf32>
    %81 = vector.shape_cast %80 : vector<1x16x256xf32> to vector<16x256xf32>
    %c4_56 = arith.constant 4 : index
    %c0_57 = arith.constant 0 : index
    %c0_58 = arith.constant 0 : index
    %82 = vector.load %arg7[%c4_56, %c0_57, %c0_58] : memref<7x256x128xf32, #tpu.memory_space<vmem>>, vector<1x256x128xf32>
    %83 = vector.shape_cast %82 : vector<1x256x128xf32> to vector<256x128xf32>
    %cst_59 = arith.constant dense<0.000000e+00> : vector<16x128xf32>
    %84 = tpu.matmul %81, %83, %cst_59 {dimension_numbers = #tpu.dot_dimension_numbers<[1], [0], [0], [1], [0, 0, 1, 1], [], []>} : vector<16x256xf32>, vector<256x128xf32>, vector<16x128xf32> -> vector<16x128xf32>
    %85 = arith.addf %79, %84 : vector<16x128xf32>
    %c0_60 = arith.constant 0 : index
    %c5 = arith.constant 5 : index
    %c0_61 = arith.constant 0 : index
    %86 = vector.load %arg9[%c0_60, %c5, %c0_61] : memref<1x22x256xf32, #tpu.memory_space<vmem>>, vector<1x16x256xf32>
    %87 = vector.shape_cast %86 : vector<1x16x256xf32> to vector<16x256xf32>
    %c5_62 = arith.constant 5 : index
    %c0_63 = arith.constant 0 : index
    %c0_64 = arith.constant 0 : index
    %88 = vector.load %arg7[%c5_62, %c0_63, %c0_64] : memref<7x256x128xf32, #tpu.memory_space<vmem>>, vector<1x256x128xf32>
    %89 = vector.shape_cast %88 : vector<1x256x128xf32> to vector<256x128xf32>
    %cst_65 = arith.constant dense<0.000000e+00> : vector<16x128xf32>
    %90 = tpu.matmul %87, %89, %cst_65 {dimension_numbers = #tpu.dot_dimension_numbers<[1], [0], [0], [1], [0, 0, 1, 1], [], []>} : vector<16x256xf32>, vector<256x128xf32>, vector<16x128xf32> -> vector<16x128xf32>
    %91 = arith.addf %85, %90 : vector<16x128xf32>
    %c0_66 = arith.constant 0 : index
    %c6 = arith.constant 6 : index
    %c0_67 = arith.constant 0 : index
    %92 = vector.load %arg9[%c0_66, %c6, %c0_67] : memref<1x22x256xf32, #tpu.memory_space<vmem>>, vector<1x16x256xf32>
    %93 = vector.shape_cast %92 : vector<1x16x256xf32> to vector<16x256xf32>
    %c6_68 = arith.constant 6 : index
    %c0_69 = arith.constant 0 : index
    %c0_70 = arith.constant 0 : index
    %94 = vector.load %arg7[%c6_68, %c0_69, %c0_70] : memref<7x256x128xf32, #tpu.memory_space<vmem>>, vector<1x256x128xf32>
    %95 = vector.shape_cast %94 : vector<1x256x128xf32> to vector<256x128xf32>
    %cst_71 = arith.constant dense<0.000000e+00> : vector<16x128xf32>
    %96 = tpu.matmul %93, %95, %cst_71 {dimension_numbers = #tpu.dot_dimension_numbers<[1], [0], [0], [1], [0, 0, 1, 1], [], []>} : vector<16x256xf32>, vector<256x128xf32>, vector<16x128xf32> -> vector<16x128xf32>
    %97 = arith.addf %91, %96 : vector<16x128xf32>
    %cst_72 = arith.constant 0.000000e+00 : f32
    %98 = vector.broadcast %cst_72 : f32 to vector<16x128xf32>
    %99 = arith.subf %98, %97 : vector<16x128xf32>
    %100 = math.exp %99 : vector<16x128xf32>
    %cst_73 = arith.constant 1.000000e+00 : f32
    %101 = vector.broadcast %cst_73 : f32 to vector<16x128xf32>
    %102 = arith.addf %101, %100 : vector<16x128xf32>
    %cst_74 = arith.constant 1.000000e+00 : f32
    %103 = vector.broadcast %cst_74 : f32 to vector<16x128xf32>
    %104 = arith.divf %103, %102 : vector<16x128xf32>
    %105 = arith.mulf %42, %104 : vector<16x128xf32>
    %106 = arith.addf %105, %9 : vector<16x128xf32>
    %cst_75 = arith.constant 0.000000e+00 : f32
    %107 = vector.broadcast %cst_75 : f32 to vector<16x128xf32>
    %108 = arith.maximumf %106, %107 : vector<16x128xf32>
    %109 = vector.shape_cast %108 : vector<16x128xf32> to vector<1x16x128xf32>
    %c0_76 = arith.constant 0 : index
    %c0_77 = arith.constant 0 : index
    %c0_78 = arith.constant 0 : index
    %110 = vector.load %arg8[%c0_76, %c0_77, %c0_78] : memref<1x16x128xf32, #tpu.memory_space<vmem>>, vector<1x16x128xf32>
    tpu.vector_store %arg8[%c0_76, %c0_77, %c0_78], %109 {strides = array<i32>} : memref<1x16x128xf32, #tpu.memory_space<vmem>>, vector<1x16x128xf32>,
    return
  }
  func.func @transform_0(%arg0: i32) -> (i32, i32, i32) {
    %c0_i32 = arith.constant 0 : i32
    %c0_i32_0 = arith.constant 0 : i32
    %c0_i32_1 = arith.constant 0 : i32
    return %arg0, %c0_i32, %c0_i32_0 : i32, i32, i32
  }
  func.func @transform_1(%arg0: i32) -> (i32, i32) {
    %c0_i32 = arith.constant 0 : i32
    %c0_i32_0 = arith.constant 0 : i32
    %c0_i32_1 = arith.constant 0 : i32
    return %c0_i32, %c0_i32_0 : i32, i32
  }
  func.func @transform_2(%arg0: i32) -> (i32, i32) {
    %c0_i32 = arith.constant 0 : i32
    %c0_i32_0 = arith.constant 0 : i32
    %c0_i32_1 = arith.constant 0 : i32
    return %c0_i32, %c0_i32_0 : i32, i32
  }
  func.func @transform_3(%arg0: i32) -> (i32, i32) {
    %c0_i32 = arith.constant 0 : i32
    %c0_i32_0 = arith.constant 0 : i32
    %c0_i32_1 = arith.constant 0 : i32
    return %c0_i32, %c0_i32_0 : i32, i32
  }
  func.func @transform_4(%arg0: i32) -> (i32, i32) {
    %c0_i32 = arith.constant 0 : i32
    %c0_i32_0 = arith.constant 0 : i32
    %c0_i32_1 = arith.constant 0 : i32
    return %c0_i32, %c0_i32_0 : i32, i32
  }
  func.func @transform_5(%arg0: i32) -> (i32, i32) {
    %c0_i32 = arith.constant 0 : i32
    %c0_i32_0 = arith.constant 0 : i32
    %c0_i32_1 = arith.constant 0 : i32
    return %c0_i32, %c0_i32_0 : i32, i32
  }
  func.func @transform_6(%arg0: i32) -> (i32, i32, i32) {
    %c0_i32 = arith.constant 0 : i32
    %c0_i32_0 = arith.constant 0 : i32
    %c0_i32_1 = arith.constant 0 : i32
    %c0_i32_2 = arith.constant 0 : i32
    return %c0_i32, %c0_i32_0, %c0_i32_1 : i32, i32, i32
  }
  func.func @transform_7(%arg0: i32) -> (i32, i32, i32) {
    %c0_i32 = arith.constant 0 : i32
    %c0_i32_0 = arith.constant 0 : i32
    %c0_i32_1 = arith.constant 0 : i32
    return %arg0, %c0_i32, %c0_i32_0 : i32, i32, i32
  }
}

</mosaic_0001>

<bundles_post_ra>
// kernel: tpu_custom_call.1
= control target key start
LH: loop header
LB: loop body
LE: loop exit
PB: predicated region body
PF: predicated region fallthrough
CT: control target
= control target key end

     0   :  { %12 = vsyncpa [#allocation4], 0  ;;  %s3180_s0 = inlined_call_operand.vmem [shape: f32[2,16,400], index: 0, kind: input, shape index: {}]   ;;  %s3181_s1 = inlined_call_operand.hbm [shape: f32[400,384], index: 1, kind: input, shape index: {}]   ;;  %s3182_s2 = inlined_call_operand.vmem [shape: f32[1,384], index: 2, kind: input, shape index: {}]   ;;  %s3183_s3 = inlined_call_operand.vmem [shape: f32[128,32], index: 3, kind: input, shape index: {}]   ;;  %s3184_s4 = inlined_call_operand.vmem [shape: f32[1,32], index: 4, kind: input, shape index: {}]   ;;  %s3185_s5 = inlined_call_operand.hbm [shape: f32[32,256], index: 5, kind: input, shape index: {}]   ;;  %s3186_s6 = inlined_call_operand.hbm [shape: f32[7,256,128], index: 6, kind: input, shape index: {}]   ;;  %s3187_s7 = inlined_call_operand.hbm [shape: f32[2,16,128], index: 7, kind: output, shape index: {}]  }
   0x1   :  { %13 = vsyncpa [#allocation7], 0 }
   0x2   :  { %14 = vsyncpa [#allocation5], 0 }
   0x3   :  { %16 = vsyncpa [#allocation5 + $0x1], 0  ;;  %s2777_s24 = smov 0   ;;  %s2779_s25 = smov 0  }
   0x4   :  { %s2781_s26 = smov 0   ;;  %s2783_s27 = smov 0  }
   0x5 LB: > { %s2798_s28 = sadd.s32 4294967295, %s2718_s27   ;;  %s2093_s29 = sadd.s32 4294967294, %s2718_s27   ;;  %s2718_s27 = sphi %s2783_s27, %s3201_s27   ;;  %s2714_s26 = sphi %s2781_s26, %s3200_s26   ;;  %s2710_s25 = sphi %s2779_s25, %s3199_s25   ;;  %s2706_s24 = sphi %s2777_s24, %s3198_s24  }
   0x6   : > { %s2802_s30 = sadd.s32 1, %s2718_s27   ;;  %s181_s8 = sadd.s32 1, %s2714_s26 }
   0x7   : > { %s178_s9 = ssub.s32 %s2718_s27, %s2802_s30  ;;  %p191_p0 = scmp.ne.s32.totalorder %s2714_s26, %s2710_s25 }
   0x8   : > { %p179_p1 = scmp.eq.s32.totalorder %s178_s9, 0  ;;  %p192_p2 = scmp.eq.s32.totalorder %s2798_s28, 1 }
   0x9   : > { %p197_p3 = scmp.ne.s32.totalorder %s2710_s25, %s2706_s24  ;;  %p198_p4 = scmp.eq.s32.totalorder %s2093_s29, 1 }
   0xa   : > { %s2813_s10 = scalar_select %p179_p1, %s2714_s26, %s181_s8  }
   0xb   : > { %p2815_p5 = por %p192_p2, %p191_p0  ;;  %p2819_p6 = por %p198_p4, %p197_p3 }
   0xc   : > { %p2094_p7 = scmp.ge.s32.totalorder %s2718_s27, 1  ;;  %p205_p8 = scmp.lt.s32.totalorder %s2718_s27, 3 }
   0xd   : > { %s3190_s12 = scalar_select %p2819_p6, 1, 0 }
   0xe   : > { %p3188_p9 = scmp.eq.s32.totalorder %s2798_s28, 0  ;;  %p2826_p10 = pnand %p2094_p7, %p205_p8 }
   0xf   : > { %s2720_s14 = smov [#allocation6]   ;;  %s2721_s17 = smov [#allocation3]  }
  0x10   : > { %s239_s15 = sshll.u32 %s2720_s14, 4  ;;  %p2488_p11 = pneg %p2826_p10  ;;  %s240_s15 = int_to_ptr.vmem [resolvable:$true] %s239_s15 }
  0x11   : > { %s217_s18 = sshll.u32 %s2721_s17, 4  ;;  %s2583_s19 = scalar_lea.vmem %s240_s15, 1024  ;;  %s218_s18 = int_to_ptr.vmem [resolvable:$true] %s217_s18 }
  0x12   : > { %p2834_p12 = pnand %p3188_p9, %p2488_p11  ;;  %p2584_p0 = scmp.ne.s32.totalorder %s240_s15, %s2583_s19 }
  0x13   : > { %p2591_p3 = scmp.lt.s32.totalorder %s240_s15, %s240_s15  ;;  %p2592_p4 = scmp.lt.s32.totalorder %s2583_s19, %s2583_s19 }
  0x14   : > { %p2574_p13 = pneg %p2834_p12 }
  0x15   : > { %p2593_p7 = por %p2592_p4, %p2591_p3 }
  0x16   : > { %p2586_p1 = pnand %p2584_p0, %p2574_p13 }
  0x18   : > { %p2587_p2 = pneg %p2586_p1 }
  0x1a   : > { %p2594_p8 = pnand %p2593_p7, %p2587_p2 }
  0x1c   : > { %2597 = shalt.err (!%p2594_p8)
}
  0x1d   : > { %s2722_s20 = smov 256   ;;  %s2723_s21 = smov 16  }
  0x1e   : > { %2494 = dma.hbm_to_vmem [thread:$0]  (!%p2834_p12), %s3185_s5, 1024, %s240_s15, [#allocation7], %s2722_s20, %s2722_s20, %s2723_s21  }
  0x1f   : > { %s2609_s29 = scalar_lea.vmem %s218_s18, 19200  ;;  %p2617_p9 = scmp.lt.s32.totalorder %s218_s18, %s218_s18 }
  0x20   : > { %p2610_p11 = scmp.ne.s32.totalorder %s218_s18, %s2609_s29  ;;  %p2618_p6 = scmp.lt.s32.totalorder %s2609_s29, %s2609_s29 }
  0x22   : > { %p2612_p0 = pnand %p2610_p11, %p2574_p13  ;;  %p2619_p3 = por %p2618_p6, %p2617_p9 }
  0x24   : > { %p2613_p1 = pneg %p2612_p0 }
  0x26   : > { %p2620_p2 = pnand %p2619_p3, %p2613_p1 }
  0x28   : > { %2623 = shalt.err (!%p2620_p2)
}
  0x29   : > { %s2724_s8 = smov 384   ;;  %s2725_s9 = smov 24  }
  0x2a   : > { %2491 = dma.hbm_to_vmem [thread:$0]  (!%p2834_p12), %s3181_s1, 19200, %s218_s18, [#allocation4], %s2724_s8, %s2724_s8, %s2725_s9  }
  0x2b   : > { %s2726_s15 = smov [#allocation8]  }
  0x2c   : > { %s252_s19 = sshll.u32 %s2726_s15, 4  ;;  %s253_s19 = int_to_ptr.vmem [resolvable:$true] %s252_s19 }
  0x2d   : > { %s2635_s20 = scalar_lea.vmem %s253_s19, 28672  ;;  %p2643_p9 = scmp.lt.s32.totalorder %s253_s19, %s253_s19 }
  0x2e   : > { %p2636_p4 = scmp.ne.s32.totalorder %s253_s19, %s2635_s20  ;;  %p2644_p8 = scmp.lt.s32.totalorder %s2635_s20, %s2635_s20 }
  0x30   : > { %p2638_p7 = pnand %p2636_p4, %p2574_p13  ;;  %p2645_p11 = por %p2644_p8, %p2643_p9 }
  0x32   : > { %p2639_p6 = pneg %p2638_p7 }
  0x34   : > { %p2646_p0 = pnand %p2645_p11, %p2639_p6 }
  0x36   : > { %2649 = shalt.err (!%p2646_p0)
}
  0x37   : > { %s2727_s21 = smov 128   ;;  %s2728_s22 = smov 8  }
  0x38   : > { %2497 = dma.hbm_to_vmem [thread:$0]  (!%p2834_p12), %s3186_s6, 28672, %s253_s19, [#allocation7], %s2727_s21, %s2727_s21, %s2728_s22  }
  0x39   : > { %276 = sbr.rel (%p2826_p10) target bundleno = 1514 (0x5ea), region = 48  ;;  %p3193_p1 = scmp.eq.s32.totalorder (!%p2826_p10), %s2798_s28, 0 }
  0x3e   : > { %2693 = dma.done.wait (%p3193_p1), [#allocation4], 19200   ;;  %p3194_p13 = pmov %p3193_p1 }
  0x3f   : > { %p3195_p3 = pmov %p3193_p1 }
  0x40   : > { %2695 = vsyncadd (%p3194_p13), [#allocation4], 4294948096 }
  0x41   : > { %2697 = dma.done.wait (%p3195_p3), [#allocation7], 29696   ;;  %p3196_p2 = pmov %p3193_p1 }
  0x42   : > { %v2729_v0 = vmov 0.0   ;;  %v375_v1 = vld [vmem:[#allocation3 + $0x170] sm:$0xff]  ;;  %v374_v2 = vld [vmem:[#allocation3 + $0x168] sm:$0xff]  ;;  %v372_v3 = vld [vmem:[#allocation3 + $0x158] sm:$0xff]  ;;  %p316_p10 = scmp.lt.s32.totalorder %s2798_s28, 1  ;;  %vm496_vm0 = vcmask 130048  }
  0x43   : > { %2699 = vsyncadd (%p3196_p2), [#allocation7], 4294937600  ;;  %1031 = vst [vmem:[#allocation2 + $0x18] sm:$0x7] %v2729_v0  ;;  %503 = vmatprep.subr.mxu0 %v375_v1  ;;  %v371_v4 = vld [vmem:[#allocation3 + $0x150] sm:$0xff]  ;;  %v369_v5 = vld [vmem:[#allocation3 + $0x140] sm:$0xff] }
  0x44   : > { %1032 = vst [vmem:[#allocation2 + $0x20] sm:$0x7] %v2729_v0  ;;  %1033 = vst [vmem:[#allocation2 + $0x8] sm:$0x38] %v2729_v0  ;;  %504 = vmatpush1.msra.mxu0 %v374_v2  ;;  %v368_v6 = vld [vmem:[#allocation3 + $0x138] sm:$0xff]  ;;  %v366_v7 = vld [vmem:[#allocation3 + $0x128] sm:$0xff] }
  0x45   : > { %1034 = vst [vmem:[#allocation2] sm:$0x38] %v2729_v0  ;;  %505 = vmatprep.subr.mxu0 %v372_v3  ;;  %v365_v8 = vld [vmem:[#allocation3 + $0x120] sm:$0xff]  ;;  %v363_v9 = vld [vmem:[#allocation3 + $0x110] sm:$0xff]  ;;  %v362_v10 = vld [vmem:[#allocation3 + $0x108] sm:$0xff]  ;;  %s2882_s13 = scalar_select %p316_p10, %s2798_s28, 1 }
  0x46   : > { %506 = vmatpush1.msra.mxu0 %v371_v4  ;;  %v360_v11 = vld [vmem:[#allocation3 + $0xf8] sm:$0xff]  ;;  %v359_v12 = vld [vmem:[#allocation3 + $0xf0] sm:$0xff]  ;;  %v357_v14 = vld [vmem:[#allocation3 + $0xe0] sm:$0xff]  ;;  %vm2730_vm1 = vmmov 0   ;;  %vm912_vm2 = vcmask 261120   ;;  %vm1037_vm3 = vcmask 1042432  }
  0x47   : > { %507 = vmatprep.subr.mxu0 %v369_v5  ;;  %v471_v13 = vld [vmem:[#allocation3 + $0x470] sm:$0xff]  ;;  %v470_v15 = vld [vmem:[#allocation3 + $0x468] sm:$0xff]  ;;  %v356_v16 = vld [vmem:[#allocation3 + $0xd8] sm:$0xff]  ;;  %s2116_s16 = sshll.u32 %s2882_s13, 6  ;;  %s2731_s18 = smov 1   ;;  %vm1137_vm4 = vcmask 1046528  }
  0x48   : > { %508 = vmatpush1.msra.mxu0 %v368_v6  ;;  %580 = vmatprep.subr.mxu1 %v471_v13  ;;  %v468_v17 = vld [vmem:[#allocation3 + $0x458] sm:$0xff]  ;;  %v467_v18 = vld [vmem:[#allocation3 + $0x450] sm:$0xff]  ;;  %v354_v19 = vld [vmem:[#allocation3 + $0xc8] sm:$0xff]  ;;  %s2888_s9 = scalar_lea.vmem %s3180_s0, %s2116_s16  ;;  %s2732_s13 = smov 2   ;;  %vm1476_vm5 = vcmask 1044480   ;;  %vm1343_vm6 = vcmask 1045504  }
  0x49   : > { %509 = vmatprep.subr.mxu0 %v366_v7  ;;  %581 = vmatpush1.msra.mxu1 %v470_v15  ;;  %v465_v20 = vld [vmem:[#allocation3 + $0x440] sm:$0xff]  ;;  %v464_v22 = vld [vmem:[#allocation3 + $0x438] sm:$0xff]  ;;  %v462_v23 = vld [vmem:[#allocation3 + $0x428] sm:$0xff]  ;;  %s2733_s16 = smov 4   ;;  %vm1609_vm7 = vcmask 1043456   ;;  %vm1874_vm8 = vcmask 1041408  }
  0x4a   : > { %510 = vmatpush1.msra.mxu0 %v365_v8  ;;  %582 = vmatprep.subr.mxu1 %v468_v17  ;;  %v353_v21 = vld [vmem:[#allocation3 + $0xc0] sm:$0xff]  ;;  %v351_v24 = vld [vmem:[#allocation3 + $0xb0] sm:$0xff]  ;;  %v350_v26 = vld [vmem:[#allocation3 + $0xa8] sm:$0xff]  ;;  %s313_s29 = sand.u32 1, %s2710_s25   ;;  %s2734_s22 = smov [#allocation9]  }
  0x4b   : > { %511 = vmatprep.subr.mxu0 %v363_v9  ;;  %583 = vmatpush1.msra.mxu1 %v467_v18  ;;  %v461_v25 = vld [vmem:[#allocation3 + $0x420] sm:$0xff]  ;;  %v459_v27 = vld [vmem:[#allocation3 + $0x410] sm:$0xff]  ;;  %v348_v28 = vld [vmem:[#allocation3 + $0x98] sm:$0xff]  ;;  %s2103_s8 = sshll.u32 %s313_s29, 4  ;;  %s3140_s21 = scalar_lea.sflag [#allocation5], %s313_s29 }
  0x4c   : > { %512 = vmatpush1.msra.mxu0 %v362_v10  ;;  %584 = vmatprep.subr.mxu1 %v465_v20  ;;  %v458_v29 = vld [vmem:[#allocation3 + $0x408] sm:$0xff]  ;;  %v347_v30 = vld [vmem:[#allocation3 + $0x90] sm:$0xff]  ;;  %v456_v31 = vld [vmem:[#allocation3 + $0x3f8] sm:$0xff]  ;;  %s315_s14 = scalar_lea.vmem [#allocation9], %s2103_s8  ;;  %s2654_s23 = sshll.u32 %s2734_s22, 4  ;;  %s2655_s23 = int_to_ptr.vmem [resolvable:$false] %s2654_s23 }
  0x4d   : > { %513 = vmatprep.subr.mxu0 %v360_v11  ;;  %585 = vmatpush1.msra.mxu1 %v464_v22  ;;  %v345_v32 = vld [vmem:[#allocation3 + $0x80] sm:$0xff]  ;;  %v455_v33 = vld [vmem:[#allocation3 + $0x3f0] sm:$0xff]  ;;  %v344_v34 = vld [vmem:[#allocation3 + $0x78] sm:$0xff]  ;;  %s2000_s17 = sshll.u32 %s315_s14, 4  ;;  %s3138_s17 = int_to_ptr.vmem [resolvable:$true] %s2000_s17 }
  0x4e   : > { %514 = vmatpush1.msra.mxu0 %v359_v12  ;;  %586 = vmatprep.subr.mxu1 %v462_v23  ;;  %v453_v35 = vld [vmem:[#allocation3 + $0x3e0] sm:$0xff]  ;;  %v342_v36 = vld [vmem:[#allocation3 + $0x68] sm:$0xff]  ;;  %v452_v37 = vld [vmem:[#allocation3 + $0x3d8] sm:$0xff]  ;;  %p2657_p6 = scmp.lt.s32.totalorder %s3138_s17, %s2655_s23 }
  0x4f   : > { %515 = vmatprep.subr.mxu0 %v357_v14  ;;  %587 = vmatpush1.msra.mxu1 %v461_v25  ;;  %v341_v38 = vld [vmem:[#allocation3 + $0x60] sm:$0xff]  ;;  %v450_v39 = vld [vmem:[#allocation3 + $0x3c8] sm:$0xff]  ;;  %v339_v40 = vld [vmem:[#allocation3 + $0x50] sm:$0xff] }
  0x50   : > { %516 = vmatpush1.msra.mxu0 %v356_v16  ;;  %588 = vmatprep.subr.mxu1 %v459_v27  ;;  %v449_v41 = vld [vmem:[#allocation3 + $0x3c0] sm:$0xff]  ;;  %v338_v42 = vld [vmem:[#allocation3 + $0x48] sm:$0xff]  ;;  %v447_v43 = vld [vmem:[#allocation3 + $0x3b0] sm:$0xff] }
  0x51   : > { %517 = vmatprep.subr.mxu0 %v354_v19  ;;  %589 = vmatpush1.msra.mxu1 %v458_v29  ;;  %v336_v44 = vld [vmem:[#allocation3 + $0x38] sm:$0xff]  ;;  %v446_v45 = vld [vmem:[#allocation3 + $0x3a8] sm:$0xff]  ;;  %v335_v46 = vld [vmem:[#allocation3 + $0x30] sm:$0xff] }
  0x52   : > { %518 = vmatpush1.msra.mxu0 %v353_v21  ;;  %590 = vmatprep.subr.mxu1 %v456_v31  ;;  %v444_v47 = vld [vmem:[#allocation3 + $0x398] sm:$0xff]  ;;  %v333_v48 = vld [vmem:[#allocation3 + $0x20] sm:$0xff]  ;;  %v443_v49 = vld [vmem:[#allocation3 + $0x390] sm:$0xff] }
  0x53   : > { %519 = vmatprep.subr.mxu0 %v351_v24  ;;  %591 = vmatpush1.msra.mxu1 %v455_v33  ;;  %v332_v50 = vld [vmem:[#allocation3 + $0x18] sm:$0xff]  ;;  %v441_v51 = vld [vmem:[#allocation3 + $0x380] sm:$0xff]  ;;  %v330_v52 = vld [vmem:[#allocation3 + $0x8] sm:$0xff] }
  0x54   : > { %520 = vmatpush1.msra.mxu0 %v350_v26  ;;  %592 = vmatprep.subr.mxu1 %v453_v35  ;;  %v440_v53 = vld [vmem:[#allocation3 + $0x378] sm:$0xff]  ;;  %v329_v54 = vld [vmem:[#allocation3] sm:$0xff]  ;;  %v438_v55 = vld [vmem:[#allocation3 + $0x368] sm:$0xff] }
  0x55   : > { %521 = vmatprep.subr.mxu0 %v348_v28  ;;  %593 = vmatpush1.msra.mxu1 %v452_v37  ;;  %v423_v56 = vld [vmem:[#allocation3 + $0x2f0] sm:$0xff]  ;;  %v437_v57 = vld [vmem:[#allocation3 + $0x360] sm:$0xff]  ;;  %v422_v58 = vld [vmem:[#allocation3 + $0x2e8] sm:$0xff] }
  0x56   : > { %522 = vmatpush1.msra.mxu0 %v347_v30  ;;  %594 = vmatprep.subr.mxu1 %v450_v39  ;;  %v435_v59 = vld [vmem:[#allocation3 + $0x350] sm:$0xff]  ;;  %v420_v60 = vld [vmem:[#allocation3 + $0x2d8] sm:$0xff]  ;;  %v434_v61 = vld [vmem:[#allocation3 + $0x348] sm:$0xff] }
  0x57   : > { %523 = vmatprep.subr.mxu0 %v345_v32  ;;  %595 = vmatpush1.msra.mxu1 %v449_v41  ;;  %v419_v62 = vld [vmem:[#allocation3 + $0x2d0] sm:$0xff]  ;;  %v432_v63 = vld [vmem:[#allocation3 + $0x338] sm:$0xff]  ;;  %v417_v1 = vld [vmem:[#allocation3 + $0x2c0] sm:$0xff] }
  0x58   : > { %524 = vmatpush1.msra.mxu0 %v344_v34  ;;  %596 = vmatprep.subr.mxu1 %v447_v43  ;;  %v431_v2 = vld [vmem:[#allocation3 + $0x330] sm:$0xff]  ;;  %v416_v3 = vld [vmem:[#allocation3 + $0x2b8] sm:$0xff]  ;;  %v429_v4 = vld [vmem:[#allocation3 + $0x320] sm:$0xff] }
  0x59   : > { %525 = vmatprep.subr.mxu0 %v342_v36  ;;  %597 = vmatpush1.msra.mxu1 %v446_v45  ;;  %v414_v5 = vld [vmem:[#allocation3 + $0x2a8] sm:$0xff]  ;;  %v428_v6 = vld [vmem:[#allocation3 + $0x318] sm:$0xff]  ;;  %v413_v7 = vld [vmem:[#allocation3 + $0x2a0] sm:$0xff] }
  0x5a   : > { %526 = vmatpush1.msra.mxu0 %v341_v38  ;;  %598 = vmatprep.subr.mxu1 %v444_v47  ;;  %v426_v8 = vld [vmem:[#allocation3 + $0x308] sm:$0xff]  ;;  %v411_v9 = vld [vmem:[#allocation3 + $0x290] sm:$0xff]  ;;  %v425_v10 = vld [vmem:[#allocation3 + $0x300] sm:$0xff] }
  0x5b   : > { %527 = vmatprep.subr.mxu0 %v339_v40  ;;  %599 = vmatpush1.msra.mxu1 %v443_v49  ;;  %v410_v11 = vld [vmem:[#allocation3 + $0x288] sm:$0xff]  ;;  %v477_v12 = vld [vmem:[#allocation3 + $0x4a0] sm:$0xff]  ;;  %v408_v13 = vld [vmem:[#allocation3 + $0x278] sm:$0xff] }
  0x5c   : > { %528 = vmatpush1.msra.mxu0 %v338_v42  ;;  %600 = vmatprep.subr.mxu1 %v441_v51  ;;  %v476_v14 = vld [vmem:[#allocation3 + $0x498] sm:$0xff]  ;;  %v407_v15 = vld [vmem:[#allocation3 + $0x270] sm:$0xff]  ;;  %v474_v16 = vld [vmem:[#allocation3 + $0x488] sm:$0xff] }
  0x5d   : > { %529 = vmatprep.subr.mxu0 %v336_v44  ;;  %601 = vmatpush1.msra.mxu1 %v440_v53  ;;  %v405_v17 = vld [vmem:[#allocation3 + $0x260] sm:$0xff]  ;;  %v2891_v18 = vld [vmem:[%s2888_s9 + $0x8] sm:$0xff]  ;;  %v402_v21 = vld [vmem:[#allocation3 + $0x248] sm:$0xff] }
  0x5e   : > { %530 = vmatpush1.msra.mxu0 %v335_v46  ;;  %602 = vmatprep.subr.mxu1 %v438_v55  ;;  %v404_v19 = vld [vmem:[#allocation3 + $0x258] sm:$0xff]  ;;  %v473_v20 = vld [vmem:[#allocation3 + $0x480] sm:$0xff]  ;;  %v2894_v22 = vld [vmem:[%s2888_s9 + $0x18] sm:$0xff] }
  0x5f   : > { %531 = vmatprep.subr.mxu0 %v333_v48  ;;  %603 = vmatpush1.msra.mxu1 %v437_v57  ;;  %v401_v23 = vld [vmem:[#allocation3 + $0x240] sm:$0xff]  ;;  %v399_v25 = vld [vmem:[#allocation3 + $0x230] sm:$0xff]  ;;  %v2901_v26 = vld [vmem:[%s2888_s9 + $0x38] sm:$0xff] }
  0x60   : > { %532 = vmatpush1.msra.mxu0 %v332_v50  ;;  %604 = vmatprep.subr.mxu1 %v435_v59  ;;  %v2898_v24 = vld [vmem:[%s2888_s9 + $0x10] sm:$0xff]  ;;  %v398_v27 = vld [vmem:[#allocation3 + $0x228] sm:$0xff]  ;;  %v424_v28 = vld [vmem:[#allocation3 + $0x2f8] sm:$0xff] }
  0x61   : > { %533 = vmatprep.subr.mxu0 %v330_v52  ;;  %605 = vmatpush1.msra.mxu1 %v434_v61  ;;  %v396_v29 = vld [vmem:[#allocation3 + $0x218] sm:$0xff]  ;;  %v395_v31 = vld [vmem:[#allocation3 + $0x210] sm:$0xff]  ;;  %v2909_v32 = vld [vmem:[%s2888_s9 + $0x30] sm:$0xff] }
  0x62   : > { %534 = vmatpush1.msra.mxu0 %v329_v54  ;;  %606 = vmatprep.subr.mxu1 %v432_v63  ;;  %v376_v30 = vld [vmem:[#allocation3 + $0x178] sm:$0xff]  ;;  %v393_v33 = vld [vmem:[#allocation3 + $0x200] sm:$0xff]  ;;  %v390_v37 = vld [vmem:[#allocation3 + $0x1e8] sm:$0xff] }
  0x63   : > { %535 = vmatprep.subr.mxu0 %v423_v56  ;;  %607 = vmatpush1.msra.mxu1 %v431_v2  ;;  %v421_v34 = vld [vmem:[#allocation3 + $0x2e0] sm:$0xff]  ;;  %v392_v35 = vld [vmem:[#allocation3 + $0x1f8] sm:$0xff]  ;;  %v418_v38 = vld [vmem:[#allocation3 + $0x2c8] sm:$0xff] }
  0x64   : > { %536 = vmatpush2.msra.mxu0 %v422_v58  ;;  %608 = vmatprep.subr.mxu1 %v429_v4  ;;  %v373_v36 = vld [vmem:[#allocation3 + $0x160] sm:$0xff]  ;;  %v370_v40 = vld [vmem:[#allocation3 + $0x148] sm:$0xff]  ;;  %v387_v41 = vld [vmem:[#allocation3 + $0x1d0] sm:$0xff] }
  0x65   : > { %537 = vmatprep.subr.mxu0 %v420_v60  ;;  %609 = vmatpush1.msra.mxu1 %v428_v6  ;;  %v389_v39 = vld [vmem:[#allocation3 + $0x1e0] sm:$0xff]  ;;  %v415_v42 = vld [vmem:[#allocation3 + $0x2b0] sm:$0xff]  ;;  %v386_v43 = vld [vmem:[#allocation3 + $0x1c8] sm:$0xff] }
  0x66   : > { %538 = vmatpush2.msra.mxu0 %v419_v62  ;;  %610 = vmatprep.subr.mxu1 %v426_v8  ;;  %v367_v44 = vld [vmem:[#allocation3 + $0x130] sm:$0xff]  ;;  %v384_v45 = vld [vmem:[#allocation3 + $0x1b8] sm:$0xff]  ;;  %v381_v49 = vld [vmem:[#allocation3 + $0x1a0] sm:$0xff] }
  0x67   : > { %539 = vmatprep.subr.mxu0 %v417_v1  ;;  %611 = vmatpush1.msra.mxu1 %v425_v10  ;;  %v412_v46 = vld [vmem:[#allocation3 + $0x298] sm:$0xff]  ;;  %v383_v47 = vld [vmem:[#allocation3 + $0x1b0] sm:$0xff]  ;;  %v409_v50 = vld [vmem:[#allocation3 + $0x280] sm:$0xff] }
  0x68   : > { %540 = vmatpush2.msra.mxu0 %v416_v3  ;;  %640 = vmatprep.subr.mxu1 %v477_v12  ;;  %v364_v48 = vld [vmem:[#allocation3 + $0x118] sm:$0xff]  ;;  %v361_v52 = vld [vmem:[#allocation3 + $0x100] sm:$0xff]  ;;  %v378_v53 = vld [vmem:[#allocation3 + $0x188] sm:$0xff] }
  0x69   : > { %541 = vmatprep.subr.mxu0 %v414_v5  ;;  %641 = vmatpush2.msra.mxu1 %v476_v14  ;;  %v380_v51 = vld [vmem:[#allocation3 + $0x198] sm:$0xff]  ;;  %v406_v54 = vld [vmem:[#allocation3 + $0x268] sm:$0xff]  ;;  %v377_v55 = vld [vmem:[#allocation3 + $0x180] sm:$0xff] }
  0x6a   : > { %542 = vmatpush2.msra.mxu0 %v413_v7  ;;  %642 = vmatprep.subr.mxu1 %v474_v16  ;;  %v358_v56 = vld [vmem:[#allocation3 + $0xe8] sm:$0xff]  ;;  %v2913_v57 = vld [vmem:[%s2888_s9] sm:$0xff]  ;;  %v2916_v58 = vld [vmem:[%s2888_s9 + $0x28] sm:$0xff] }
  0x6b   : > { %543 = vmatprep.subr.mxu0 %v411_v9  ;;  %567 = vmatprep.mubr.f32.mxu0 %v2891_v18  ;;  %v472_v59 = vld [vmem:[#allocation3 + $0x478] sm:$0xff]  ;;  %v403_v60 = vld [vmem:[#allocation3 + $0x250] sm:$0xff]  ;;  %v469_v61 = vld [vmem:[#allocation3 + $0x460] sm:$0xff] }
  0x6c   : > { %544 = vmatpush2.msra.mxu0 %v410_v11  ;;  %643 = vmatpush2.msra.mxu1 %v473_v20  ;;  %v355_v62 = vld [vmem:[#allocation3 + $0xd0] sm:$0xff]  ;;  %v466_v1 = vld [vmem:[#allocation3 + $0x448] sm:$0xff]  ;;  %v400_v2 = vld [vmem:[#allocation3 + $0x238] sm:$0xff] }
  0x6d   : > { %545 = vmatprep.subr.mxu0 %v408_v13  ;;  %2106 = vmatprep.mubr.msk.f32.mxu1 %vm496_vm0, %v2894_v22  ;;  %v2922_v63 = vld [vmem:[%s2888_s9 + $0x20] sm:$0xff]  ;;  %v352_v3 = vld [vmem:[#allocation3 + $0xb8] sm:$0xff]  ;;  %v397_v5 = vld [vmem:[#allocation3 + $0x220] sm:$0xff]  ;;  %s2117_s9 = sshll.u32 %s2798_s28, 8  ;;  %s2650_s28 = scalar_lea.vmem %s3138_s17, 256 }
  0x6e   : > { %546 = vmatpush2.msra.mxu0 %v407_v15  ;;  %645 = vmatmul.mubr.f32.vlgmr.msra.gmra.mxu1 %v2898_v24  ;;  %v463_v4 = vld [vmem:[#allocation3 + $0x430] sm:$0xff]  ;;  %v349_v6 = vld [vmem:[#allocation3 + $0xa0] sm:$0xff]  ;;  %v460_v7 = vld [vmem:[#allocation3 + $0x418] sm:$0xff]  ;;  %s3136_s20 = scalar_lea.hbm %s3187_s7, %s2117_s9  ;;  %p2651_p12 = scmp.ne.s32.totalorder %s3138_s17, %s2650_s28 }
  0x6f   : > { %547 = vmatprep.subr.mxu0 %v405_v17  ;;  %2107 = vmatprep.mubr.msk.f32.mxu1 %vm496_vm0, %v2901_v26  ;;  %v394_v8 = vld [vmem:[#allocation3 + $0x208] sm:$0xff]  ;;  %v457_v10 = vld [vmem:[#allocation3 + $0x400] sm:$0xff]  ;;  %v391_v11 = vld [vmem:[#allocation3 + $0x1f0] sm:$0xff] }
  0x70   : > { %548 = vmatpush2.msra.mxu0 %v404_v19  ;;  %2118 = vmatprep.subr.mxu1 %v424_v28  ;;  %v346_v9 = vld [vmem:[#allocation3 + $0x88] sm:$0xff]  ;;  %v343_v12 = vld [vmem:[#allocation3 + $0x70] sm:$0xff]  ;;  %v388_v14 = vld [vmem:[#allocation3 + $0x1d8] sm:$0xff]  ;;  %p2652_p4 = pnand %p2651_p12, %p2815_p5 }
  0x71   : > { %549 = vmatprep.subr.mxu0 %v402_v21  ;;  %2119 = vmatpush3.msra.mxu1 %v376_v30  ;;  %v454_v13 = vld [vmem:[#allocation3 + $0x3e8] sm:$0xff]  ;;  %v340_v15 = vld [vmem:[#allocation3 + $0x58] sm:$0xff]  ;;  %v451_v16 = vld [vmem:[#allocation3 + $0x3d0] sm:$0xff] }
  0x72   : > { %550 = vmatpush2.msra.mxu0 %v401_v23  ;;  %651 = vmatmul.mubr.f32.gmra.mxu1 %v2909_v32  ;;  %v385_v17 = vld [vmem:[#allocation3 + $0x1c0] sm:$0xff]  ;;  %v448_v20 = vld [vmem:[#allocation3 + $0x3b8] sm:$0xff]  ;;  %v382_v21 = vld [vmem:[#allocation3 + $0x1a8] sm:$0xff]  ;;  %p2653_p7 = pneg %p2652_p4 }
  0x73   : > { %551 = vmatprep.subr.mxu0 %v399_v25  ;;  %2120 = vmatprep.subr.mxu1 %v421_v34  ;;  %v337_v19 = vld [vmem:[#allocation3 + $0x40] sm:$0xff]  ;;  %v334_v23 = vld [vmem:[#allocation3 + $0x28] sm:$0xff]  ;;  %v331_v28 = vld [vmem:[#allocation3 + $0x10] sm:$0xff] }
  0x74   : > { %552 = vmatpush2.msra.mxu0 %v398_v27  ;;  %2121 = vmatpush3.msra.mxu1 %v373_v36  ;;  %v445_v25 = vld [vmem:[#allocation3 + $0x3a0] sm:$0xff]  ;;  %v379_v27 = vld [vmem:[#allocation3 + $0x190] sm:$0xff] }
  0x75   : > { %553 = vmatprep.subr.mxu0 %v396_v29  ;;  %2122 = vmatprep.subr.mxu1 %v418_v38  ;;  %v442_v29 = vld [vmem:[#allocation3 + $0x388] sm:$0xff]  ;;  %v439_v30 = vld [vmem:[#allocation3 + $0x370] sm:$0xff]  ;;  %v830_v34 = vld [vmem:[%s3183_s3 + $0x70] sm:$0xff] }
  0x76   : > { %554 = vmatpush2.msra.mxu0 %v395_v31  ;;  %2123 = vmatpush3.msra.mxu1 %v370_v40  ;;  %v831_v31 = vld [vmem:[%s3183_s3 + $0x78] sm:$0xff]  ;;  %v427_v36 = vld [vmem:[#allocation3 + $0x310] sm:$0xff] }
  0x77   : > { %555 = vmatprep.subr.mxu0 %v393_v33  ;;  %2124 = vmatprep.subr.mxu1 %v415_v42  ;;  %v436_v33 = vld [vmem:[#allocation3 + $0x358] sm:$0xff]  ;;  %v475_v38 = vld [vmem:[#allocation3 + $0x490] sm:$0xff]  ;;  %v822_v42 = vld [vmem:[%s3183_s3 + $0x30] sm:$0xff] }
  0x78   : > { %556 = vmatpush2.msra.mxu0 %v392_v35  ;;  %2125 = vmatpush3.msra.mxu1 %v367_v44  ;;  %v433_v35 = vld [vmem:[#allocation3 + $0x340] sm:$0xff]  ;;  %v824_v40 = vld [vmem:[%s3183_s3 + $0x40] sm:$0xff] }
  0x79   : > { %557 = vmatprep.subr.mxu0 %v390_v37  ;;  %2126 = vmatprep.subr.mxu1 %v412_v46  ;;  %v478_v37 = vld [vmem:[#allocation3 + $0x4a8] sm:$0xff]  ;;  %v820_v44 = vld [vmem:[%s3183_s3 + $0x20] sm:$0xff]  ;;  %v818_v46 = vld [vmem:[%s3183_s3 + $0x10] sm:$0xff] }
  0x7a   : > { %558 = vmatpush2.msra.mxu0 %v389_v39  ;;  %2127 = vmatpush3.msra.mxu1 %v364_v48  ;;  %v828_v39 = vld [vmem:[%s3183_s3 + $0x60] sm:$0xff] }
  0x7b   : > { %559 = vmatprep.subr.mxu0 %v387_v41  ;;  %2128 = vmatprep.subr.mxu1 %v409_v50  ;;  %v823_v41 = vld [vmem:[%s3183_s3 + $0x38] sm:$0xff]  ;;  %v816_v48 = vld [vmem:[%s3183_s3] sm:$0xff]  ;;  %v910_v50 = vld [vmem:[#allocation6 + $0x30] sm:$0xff] }
  0x7c   : > { %560 = vmatpush2.msra.mxu0 %v386_v43  ;;  %2129 = vmatpush3.msra.mxu1 %v361_v52  ;;  %v821_v43 = vld [vmem:[%s3183_s3 + $0x28] sm:$0xff]  ;;  %v908_v52 = vld [vmem:[#allocation6 + $0x20] sm:$0xff] }
  0x7d   : > { %561 = vmatprep.subr.mxu0 %v384_v45  ;;  %2130 = vmatprep.subr.mxu1 %v406_v54  ;;  %v819_v45 = vld [vmem:[%s3183_s3 + $0x18] sm:$0xff] }
  0x7e   : > { %562 = vmatpush2.msra.mxu0 %v383_v47  ;;  %2131 = vmatpush3.msra.mxu1 %v358_v56  ;;  %v817_v47 = vld [vmem:[%s3183_s3 + $0x8] sm:$0xff] }
  0x7f   : > { %563 = vmatprep.subr.mxu0 %v381_v49  ;;  %2132 = vmatprep.subr.mxu1 %v403_v60  ;;  %v911_v49 = vld [vmem:[#allocation6 + $0x38] sm:$0xff] }
  0x80   : > { %564 = vmatpush2.msra.mxu0 %v380_v51  ;;  %2133 = vmatpush3.msra.mxu1 %v355_v62  ;;  %v909_v51 = vld [vmem:[#allocation6 + $0x28] sm:$0xff] }
  0x81   : > { %565 = vmatprep.subr.mxu0 %v378_v53  ;;  %2134 = vmatprep.subr.mxu1 %v400_v2  ;;  %v481_v53 = vlaneseq }
  0x82   : > { %566 = vmatpush2.msra.mxu0 %v377_v55  ;;  %2135 = vmatpush3.msra.mxu1 %v352_v3 }
  0x83   : > { %568 = vmatmul.mubr.f32.vlgmr.msra.gmra.mxu0 %v2913_v57  ;;  %732 = vmatprep.subr.mxu0 %v2729_v0  ;;  %v482_v54 = vshrl.u32 %v481_v53, 7 }
  0x84   : > { %573 = vmatprep.mubr.f32.mxu0 %v2916_v58  ;;  %733 = vmatpush1.msra.mxu0 %v472_v59 }
  0x85   : > { %734 = vmatprep.subr.mxu0 %v2729_v0  ;;  %2136 = vmatprep.subr.mxu1 %v397_v5  ;;  %v487_v55 = vsub.s32 1, %v482_v54 }
  0x86   : > { %735 = vmatpush1.msra.mxu0 %v469_v61  ;;  %2137 = vmatpush3.msra.mxu1 %v349_v6 }
  0x87   : > { %574 = vmatmul.mubr.f32.gmra.mxu0 %v2922_v63  ;;  %736 = vmatprep.subr.mxu0 %v2729_v0 }
  0x88   : > { %737 = vmatpush1.msra.mxu0 %v466_v1  ;;  %2138 = vmatprep.subr.mxu1 %v394_v8 }
  0x89   : > { %738 = vmatprep.subr.mxu0 %v2729_v0  ;;  %2139 = vmatpush3.msra.mxu1 %v346_v9 }
  0x8a   : > { %739 = vmatpush1.msra.mxu0 %v463_v4  ;;  %2140 = vmatprep.subr.mxu1 %v391_v11 }
  0x8b   : > { %740 = vmatprep.subr.mxu0 %v2729_v0  ;;  %2141 = vmatpush3.msra.mxu1 %v343_v12 }
  0x8c   : > { %741 = vmatpush1.msra.mxu0 %v460_v7  ;;  %2142 = vmatprep.subr.mxu1 %v388_v14 }
  0x8d   : > { %742 = vmatprep.subr.mxu0 %v2729_v0  ;;  %2143 = vmatpush3.msra.mxu1 %v340_v15 }
  0x8e   : > { %743 = vmatpush1.msra.mxu0 %v457_v10  ;;  %2144 = vmatprep.subr.mxu1 %v385_v17 }
  0x8f   : > { %744 = vmatprep.subr.mxu0 %v2729_v0  ;;  %2145 = vmatpush3.msra.mxu1 %v337_v19 }
  0x90   : > { %745 = vmatpush1.msra.mxu0 %v454_v13  ;;  %2146 = vmatprep.subr.mxu1 %v382_v21 }
  0x91   : > { %746 = vmatprep.subr.mxu0 %v2729_v0  ;;  %2147 = vmatpush3.msra.mxu1 %v334_v23 }
  0x92   : > { %747 = vmatpush1.msra.mxu0 %v451_v16  ;;  %2148 = vmatprep.subr.mxu1 %v379_v27 }
  0x93   : > { %748 = vmatprep.subr.mxu0 %v2729_v0  ;;  %2149 = vmatpush3.msra.mxu1 %v331_v28  ;;  %v491_v28 = vsub.s32 2, %v482_v54 }
  0x94   : > { %749 = vmatpush1.msra.mxu0 %v448_v20  ;;  %721 = vmatprep.mubr.f32.mxu1 %v2891_v18  ;;  %v430_v18 = vld [vmem:[#allocation3 + $0x328] sm:$0xff] }
  0x95   : > { %750 = vmatprep.subr.mxu0 %v2729_v0  ;;  %722 = vmatmul.mubr.f32.vlgmr.msra.gmra.mxu1 %v2913_v57  ;;  %v3018_v57 = vsub.s32 0, %v482_v54 }
  0x96   : > { %751 = vmatpush1.msra.mxu0 %v445_v25  ;;  %2439 = vmatprep.subr.mxu1 %v2729_v0 }
  0x97   : > { %752 = vmatprep.subr.mxu0 %v2729_v0  ;;  %2440 = vmatpush3.msra.mxu1 %v831_v31 }
  0x98   : > { %753 = vmatpush1.msra.mxu0 %v442_v29  ;;  %2441 = vmatprep.subr.mxu1 %v2729_v0 }
  0x99   : > { %754 = vmatprep.subr.mxu0 %v2729_v0  ;;  %2442 = vmatpush3.msra.mxu1 %v830_v34 }
  0x9a   : > { %755 = vmatpush1.msra.mxu0 %v439_v30  ;;  %2108 = vmatprep.mubr.msk.f32.mxu0 %vm496_vm0, %v2894_v22  ;;  %v829_v22 = vld [vmem:[%s3183_s3 + $0x68] sm:$0xff] }
  0x9b   : > { %756 = vmatprep.subr.mxu0 %v2729_v0  ;;  %2443 = vmatprep.subr.mxu1 %v2729_v0 }
  0x9c   : > { %757 = vmatpush1.msra.mxu0 %v436_v33  ;;  %726 = vmatprep.mubr.f32.mxu1 %v2916_v58  ;;  %v479_v58 = vld [vmem:[%s3182_s2] sm:$0x7] }
  0x9d   : > { %758 = vmatprep.subr.mxu0 %v2729_v0  ;;  %727 = vmatmul.mubr.f32.gmra.mxu1 %v2922_v63  ;;  %v488_v59 = vrot.slane %v479_v58, %v487_v55  ;;  %v484_v61 = vrot.slane %v479_v58, %v3018_v57  ;;  %v492_v29 = vrot.slane %v479_v58, %v491_v28  ;;  %v1127_v28 = vld [vmem:[#allocation8 + $0x1e0] sm:$0xff] }
  0x9e   : > { %759 = vmatpush1.msra.mxu0 %v433_v35  ;;  %2444 = vmatpush3.msra.mxu1 %v829_v22 }
  0x9f   : > { %760 = vmatprep.subr.mxu0 %v2729_v0  ;;  %2445 = vmatprep.subr.mxu1 %v2729_v0 }
  0xa0   : > { %761 = vmatpush1.msra.mxu0 %v430_v18  ;;  %2446 = vmatpush3.msra.mxu1 %v828_v39 }
  0xa1   : > { %762 = vmatprep.subr.mxu0 %v2729_v0  ;;  %2447 = vmatprep.subr.mxu1 %v2729_v0 }
  0xa2   : > { %763 = vmatpush1.msra.mxu0 %v427_v36  ;;  %2471 = vmatprep.mubr.msk.f32.mxu1 %vm2730_vm1, %v2729_v0 }
  0xa3   : > { %792 = vmatprep.subr.mxu0 %v2729_v0 }
  0xa4   : > { %793 = vmatpush2.msra.mxu0 %v478_v37 }
  0xa5   : > { %794 = vmatprep.subr.mxu0 %v2729_v0 }
  0xa6   : > { %795 = vmatpush2.msra.mxu0 %v475_v38 }
  0xa7   : > { %797 = vmatmul.mubr.f32.vlgmr.msra.gmra.mxu0 %v2898_v24  ;;  %v827_v24 = vld [vmem:[%s3183_s3 + $0x58] sm:$0xff]  ;;  %940 = vmatprep.subr.mxu0 %v911_v49 }
  0xa8   : > { %2109 = vmatprep.mubr.msk.f32.mxu0 %vm496_vm0, %v2901_v26  ;;  %2448 = vmatpush3.msra.mxu1 %v827_v24  ;;  %v826_v26 = vld [vmem:[%s3183_s3 + $0x50] sm:$0xff]  ;;  %v907_v24 = vld [vmem:[#allocation6 + $0x18] sm:$0xff] }
  0xa9   : > { %2449 = vmatprep.subr.mxu1 %v2729_v0  ;;  %941 = vmatpush1.msra.mxu0 %v910_v50 }
  0xaa   : > { %2450 = vmatpush3.msra.mxu1 %v826_v26  ;;  %942 = vmatprep.subr.mxu0 %v909_v51  ;;  %v906_v26 = vld [vmem:[#allocation6 + $0x10] sm:$0xff] }
  0xab   : > { %802 = vmatmul.mubr.f32.gmra.mxu0 %v2909_v32  ;;  %2451 = vmatprep.subr.mxu1 %v2729_v0  ;;  %v825_v32 = vld [vmem:[%s3183_s3 + $0x48] sm:$0xff] }
  0xac   : > { %980 = vmatprep.mubr.f32.mxu0 %v2729_v0  ;;  %2452 = vmatpush3.msra.mxu1 %v825_v32  ;;  %v905_v32 = vld [vmem:[#allocation6 + $0x8] sm:$0xff] }
  0xad   : > { %2453 = vmatprep.subr.mxu1 %v2729_v0  ;;  %943 = vmatpush1.msra.mxu0 %v908_v52 }
  0xae   : > { %2454 = vmatpush3.msra.mxu1 %v824_v40  ;;  %944 = vmatprep.subr.mxu0 %v907_v24  ;;  %v904_v40 = vld [vmem:[#allocation6] sm:$0xff]  ;;  %v1125_v24 = vld [vmem:[#allocation8 + $0x1d0] sm:$0xff] }
  0xaf   : > { %2455 = vmatprep.subr.mxu1 %v2729_v0  ;;  %945 = vmatpush1.msra.mxu0 %v906_v26  ;;  %v1070_v26 = vld [vmem:[#allocation8 + $0x40] sm:$0xff] }
  0xb0   : > { %2456 = vmatpush3.msra.mxu1 %v823_v41  ;;  %946 = vmatprep.subr.mxu0 %v905_v32  ;;  %v832_v41 = vld [vmem:[%s3184_s4] sm:$0x1]  ;;  %v1109_v32 = vld [vmem:[#allocation8 + $0x150] sm:$0xff] }
  0xb1   : > { %2457 = vmatprep.subr.mxu1 %v2729_v0  ;;  %947 = vmatpush1.msra.mxu0 %v904_v40  ;;  %v1085_v40 = vld [vmem:[#allocation8 + $0xb8] sm:$0xff] }
  0xb2   : > { %2458 = vmatpush3.msra.mxu1 %v822_v42 }
  0xb3   : > { %2459 = vmatprep.subr.mxu1 %v2729_v0 }
  0xb4   : > { %2460 = vmatpush3.msra.mxu1 %v821_v43 }
  0xb5   : > { %2461 = vmatprep.subr.mxu1 %v2729_v0 }
  0xb6   : > { %2462 = vmatpush3.msra.mxu1 %v820_v44 }
  0xb7   : > { %2463 = vmatprep.subr.mxu1 %v2729_v0 }
  0xb8   : > { %2464 = vmatpush3.msra.mxu1 %v819_v45 }
  0xb9   : > { %2465 = vmatprep.subr.mxu1 %v2729_v0 }
  0xba   : > { %2466 = vmatpush3.msra.mxu1 %v818_v46 }
  0xbb   : > { %2467 = vmatprep.subr.mxu1 %v2729_v0 }
  0xbc   : > { %2468 = vmatpush3.msra.mxu1 %v817_v47 }
  0xbd   : > { %2469 = vmatprep.subr.mxu1 %v2729_v0 }
  0xbe   : > { %2470 = vmatpush3.msra.mxu1 %v816_v48 }
 0x12e   : > { %v646_v56 = vpop.f32.mrf.mxu1 }
 0x130   : > { %v648_v60 = vpop.f32.mrf.mxu1 }
 0x132   : > { %v652_v2 = vpop.f32.mrf.mxu1 }
 0x134   : > { %v654_v8 = vpop.f32.mrf.mxu1 }
 0x143   : > { %v569_v0 = vpop.f32.mrf.mxu0 }
 0x144   : > { %v570_v3 = vadd.f32 %v569_v0, %v484_v61 }
 0x145   : > { %v571_v62 = vpop.f32.mrf.mxu0 }
 0x146   : > { %v572_v63 = vadd.f32 %v571_v62, %v488_v59  ;;  %v647_v9 = vadd.f32 %v646_v56, %v570_v3 }
 0x147   : > { %v575_v1 = vpop.f32.mrf.mxu0 }
 0x148   : > { %v576_v4 = vadd.f32 %v575_v1, %v484_v61  ;;  %v3024_v6 = vadd.f32 %v648_v60, %v572_v63 }
 0x149   : > { %v577_v5 = vpop.f32.mrf.mxu0 }
 0x14a   : > { %v578_v7 = vadd.f32 %v577_v5, %v488_v59  ;;  %v3026_v10 = vadd.f32 %v652_v2, %v576_v4  ;;  %v807_v12 = vadd.f32 %v3024_v6, %v647_v9 }
 0x14c   : > { %v3028_v11 = vadd.f32 %v654_v8, %v578_v7  ;;  %v1077_v7 = vld [vmem:[#allocation8 + $0x78] sm:$0xff]  ;;  %v1092_v8 = vld [vmem:[#allocation8 + $0xf0] sm:$0xff] }
 0x14e   : > { %v808_v13 = vadd.f32 %v3028_v11, %v3026_v10 }
 0x150   : > { %v809_v14 = vadd.f32 %v808_v13, %v807_v12  ;;  %v1075_v12 = vld [vmem:[#allocation8 + $0x68] sm:$0xff]  ;;  %v1114_v13 = vld [vmem:[#allocation8 + $0x178] sm:$0xff] }
 0x152   : > { %v810_v15 = vrot.slane %v809_v14, 4 }
 0x154   : > { %v811_v16 = vadd.f32 %v810_v15, %v809_v14  ;;  %v1090_v15 = vld [vmem:[#allocation8 + $0xe0] sm:$0xff] }
 0x155   : > { %v2150_v20 = vpop.f32.mrf.mxu1 }
 0x156   : > { %v812_v17 = vrot.slane %v811_v16, 2 }
 0x157   : > { %v2151_v23 = vpop.f32.mrf.mxu1 }
 0x158   : > { %v813_v19 = vadd.f32 %v812_v17, %v811_v16  ;;  %v2152_v27 = vadd.f32 %v2151_v23, %v2150_v20  ;;  %v1129_v16 = vld [vmem:[#allocation8 + $0x1f0] sm:$0xff]  ;;  %v1074_v20 = vld [vmem:[#allocation8 + $0x60] sm:$0xff]  ;;  %v1089_v23 = vld [vmem:[#allocation8 + $0xd8] sm:$0xff] }
 0x159   : > { %v1113_v17 = vld [vmem:[#allocation8 + $0x170] sm:$0xff] }
 0x15a   : > { %v814_v21 = vrot.slane %v813_v19, 1  ;;  %v724_v33 = vadd.f32 %v2152_v27, %v492_v29  ;;  %v1073_v27 = vld [vmem:[#allocation8 + $0x58] sm:$0xff] }
 0x15c   : > { %v815_v25 = vadd.f32 %v814_v21, %v813_v19  ;;  %v1128_v21 = vld [vmem:[#allocation8 + $0x1e8] sm:$0xff] }
 0x15d   : > { %v2153_v30 = vpop.f32.mrf.mxu1 }
 0x15e   : > { %2472 = vmatmul.mubr.f32.vlgmr.msra.gmra.mxu1 %v815_v25  ;;  %v1112_v25 = vld [vmem:[#allocation8 + $0x168] sm:$0xff] }
 0x15f   : > { %v2154_v31 = vpop.f32.mrf.mxu1 }
 0x160   : > { %v2155_v34 = vadd.f32 %v2154_v31, %v2153_v30  ;;  %v1088_v30 = vld [vmem:[#allocation8 + $0xd0] sm:$0xff] }
 0x162   : > { %v729_v36 = vadd.f32 %v2155_v34, %v492_v29  ;;  %v1111_v34 = vld [vmem:[#allocation8 + $0x160] sm:$0xff] }
 0x167   : > { %v798_v35 = vpop.f32.mrf.mxu0 }
 0x168   : > { %v3033_v18 = vadd.f32 %v798_v35, %v724_v33  ;;  %v1072_v33 = vld [vmem:[#allocation8 + $0x50] sm:$0xff]  ;;  %v1087_v35 = vld [vmem:[#allocation8 + $0xc8] sm:$0xff] }
 0x169   : > { %v800_v37 = vpop.f32.mrf.mxu0 }
 0x16a   : > { %v1071_v37 = vld [vmem:[#allocation8 + $0x48] sm:$0xff] }
 0x16b   : > { %v803_v38 = vpop.f32.mrf.mxu0 }
 0x16c   : > { %v3035_v22 = vadd.f32 %v803_v38, %v729_v36  ;;  %v1126_v36 = vld [vmem:[#allocation8 + $0x1d8] sm:$0xff] }
 0x16d   : > { %v805_v39 = vpop.f32.mrf.mxu0  ;;  %v1110_v38 = vld [vmem:[#allocation8 + $0x158] sm:$0xff] }
 0x16e   : > { %v1086_v39 = vld [vmem:[#allocation8 + $0xc0] sm:$0xff] }
 0x21e   : > { %v899_v42 = vpop.f32.mrf.mxu1 }
 0x21f   : > { %v900_v43 = vadd.f32 %v899_v42, %v832_v41  ;;  %v1069_v41 = vld [vmem:[#allocation8 + $0x38] sm:$0xff]  ;;  %v1084_v42 = vld [vmem:[#allocation8 + $0xb0] sm:$0xff] }
 0x220   : > { %v2473_v44 = vpop.f32.mrf.mxu1 }
 0x221   : > { %v903_v45 = vmax.f32 %v900_v43, 0.0  ;;  %v1068_v43 = vld [vmem:[#allocation8 + $0x30] sm:$0xff]  ;;  %v1124_v44 = vld [vmem:[#allocation8 + $0x1c8] sm:$0xff] }
 0x223   : > { %2110 = vmatmul.mubr.msk.f32.vlgmr.msra.gmra.mxu0 %vm912_vm2, %v903_v45  ;;  %v1108_v45 = vld [vmem:[#allocation8 + $0x148] sm:$0xff] }
 0x2e3   : > { %v982_v46 = vpop.f32.mrf.mxu0 }
 0x2e5   : > { %v984_v47 = vpop.f32.mrf.mxu0 }
 0x2e6   : > { %v987_v48 = vmax.f32 %v982_v46, %v984_v47 }
 0x2e8   : > { %v988_v49 = vsub.f32 %v982_v46, %v987_v48  ;;  %v991_v50 = vsub.f32 %v984_v47, %v987_v48  ;;  %v1123_v46 = vld [vmem:[#allocation8 + $0x1c0] sm:$0xff]  ;;  %v1122_v48 = vld [vmem:[#allocation8 + $0x1b8] sm:$0xff] }
 0x2e9   : > { %v1107_v47 = vld [vmem:[#allocation8 + $0x140] sm:$0xff] }
 0x2ea   : > { %v989_v51 = vmul.f32 1.442695, %v988_v49  ;;  %v992_v52 = vmul.f32 1.442695, %v991_v50  ;;  %v1083_v49 = vld [vmem:[#allocation8 + $0xa8] sm:$0xff]  ;;  %v1106_v50 = vld [vmem:[#allocation8 + $0x138] sm:$0xff] }
 0x2ec   : > { %2557 = vpow2.f32 %v989_v51  ;;  %v1067_v51 = vld [vmem:[#allocation8 + $0x28] sm:$0xff] }
 0x2ed   : > { %2559 = vpow2.f32 %v992_v52  ;;  %v1121_v52 = vld [vmem:[#allocation8 + $0x1b0] sm:$0xff] }
 0x2f9   : > { %v2558_v53 = vpop.eup %2557 }
 0x2fa   : > { %v2560_v54 = vpop.eup %2559 }
 0x2fb   : > { %v994_v55 = vadd.f32 %v2560_v54, %v2558_v53 }
 0x2fd   : > { %2561 = vrcp.f32 %v994_v55  ;;  %v1066_v55 = vld [vmem:[#allocation8 + $0x20] sm:$0xff] }
 0x30a   : > { %v2562_v56 = vpop.eup %2561 }
 0x30b   : > { %v997_v58 = vmul.f32 %v2562_v56, %v2558_v53  ;;  %v998_v59 = vmul.f32 %v2562_v56, %v2560_v54  ;;  %v1082_v53 = vld [vmem:[#allocation8 + $0xa0] sm:$0xff]  ;;  %v1105_v54 = vld [vmem:[#allocation8 + $0x130] sm:$0xff]  ;;  %v1120_v56 = vld [vmem:[#allocation8 + $0x1a8] sm:$0xff] }
 0x30d   : > { %v1002_v0 = vrot.slane %v997_v58, %v3018_v57  ;;  %v1008_v60 = vrot.slane %v998_v59, %v3018_v57  ;;  %v1081_v58 = vld [vmem:[#allocation8 + $0x98] sm:$0xff]  ;;  %v1104_v59 = vld [vmem:[#allocation8 + $0x128] sm:$0xff] }
 0x30f   : > { %v1003_v61 = vmul.f32 %v1002_v0, %v647_v9  ;;  %v1009_v62 = vmul.f32 %v1008_v60, %v3024_v6  ;;  %v1004_v63 = vmul.f32 %v1002_v0, %v3026_v10  ;;  %v1010_v1 = vmul.f32 %v1008_v60, %v3028_v11  ;;  %v1093_v6 = vld [vmem:[#allocation8 + $0xf8] sm:$0xff]  ;;  %v1076_v9 = vld [vmem:[#allocation8 + $0x70] sm:$0xff]  ;;  %v1091_v10 = vld [vmem:[#allocation8 + $0xe8] sm:$0xff] }
 0x310   : > { %2211 = vmatprep.subr.mxu0 %v1093_v6  ;;  %v1130_v11 = vld [vmem:[#allocation8 + $0x1f8] sm:$0xff]  ;;  %v1119_v60 = vld [vmem:[#allocation8 + $0x1a0] sm:$0xff]  ;;  %v1063_v6 = vld [vmem:[#allocation8 + $0x8] sm:$0xff] }
 0x311   : > { %v3045_v2 = vadd.f32 %v1009_v62, %v1003_v61  ;;  %v3047_v3 = vadd.f32 %v1010_v1, %v1004_v63  ;;  %2212 = vmatpush3.msra.mxu0 %v1077_v7  ;;  %2173 = vmatprep.subr.mxu1 %v1130_v11  ;;  %v1065_v0 = vld [vmem:[#allocation8 + $0x18] sm:$0xff]  ;;  %v1080_v61 = vld [vmem:[#allocation8 + $0x90] sm:$0xff]  ;;  %v1103_v62 = vld [vmem:[#allocation8 + $0x120] sm:$0xff] }
 0x312   : > { %2213 = vmatprep.subr.mxu0 %v1092_v8  ;;  %2174 = vmatpush3.msra.mxu1 %v1114_v13  ;;  %v1064_v63 = vld [vmem:[#allocation8 + $0x10] sm:$0xff]  ;;  %v1118_v1 = vld [vmem:[#allocation8 + $0x198] sm:$0xff]  ;;  %v1078_v7 = vld [vmem:[#allocation8 + $0x80] sm:$0xff] }
 0x313   : > { %1013 = vrot.lane.b32.xlu0 %v3045_v2, %s2731_s18  ;;  %v1038_v4 = vrot.slane %v3045_v2, 5  ;;  %v1039_v5 = vrot.slane %v3047_v3, 5  ;;  %2214 = vmatpush3.msra.mxu0 %v1076_v9  ;;  %v1062_v8 = vld [vmem:[#allocation8] sm:$0xff]  ;;  %v1117_v9 = vld [vmem:[#allocation8 + $0x190] sm:$0xff]  ;;  %v1471_v13 = vld [vmem:[#allocation8 + $0x3f8] sm:$0xff] }
 0x314   : > { %2215 = vmatprep.subr.mxu0 %v1091_v10  ;;  %2175 = vmatprep.subr.mxu1 %v1129_v16  ;;  %v1101_v11 = vld [vmem:[#allocation8 + $0x110] sm:$0xff]  ;;  %v1115_v16 = vld [vmem:[#allocation8 + $0x180] sm:$0xff] }
 0x315   : > { %1044 = vst [vmem:[#allocation2 + $0x18] sm:$0xf8] %v1038_v4  ;;  %1046 = vst [vmem:[#allocation2 + $0x8] sm:$0x7] %v1039_v5  ;;  %v3053_v57 = vsel %vm1037_vm3, %v1038_v4, %v1039_v5  ;;  %2216 = vmatpush3.msra.mxu0 %v1075_v12  ;;  %2176 = vmatpush3.msra.mxu1 %v1113_v17  ;;  %v1079_v4 = vld [vmem:[#allocation8 + $0x88] sm:$0xff]  ;;  %v1102_v5 = vld [vmem:[#allocation8 + $0x118] sm:$0xff] }
 0x316   : > { %1045 = vst [vmem:[#allocation2 + $0x28] sm:$0xff] %v3053_v57  ;;  %2217 = vmatprep.subr.mxu0 %v1090_v15  ;;  %2177 = vmatprep.subr.mxu1 %v1128_v21  ;;  %v1100_v15 = vld [vmem:[#allocation8 + $0x108] sm:$0xff] }
 0x317   : > { %1015 = vrot.lane.b32.xlu0 %v3047_v3, %s2731_s18  ;;  %2218 = vmatpush3.msra.mxu0 %v1074_v20  ;;  %v1099_v20 = vld [vmem:[#allocation8 + $0x100] sm:$0xff]  ;;  %s2656_s18 = scalar_lea.vmem %s2655_s23, 512 }
 0x318   : > { %2219 = vmatprep.subr.mxu0 %v1089_v23  ;;  %2178 = vmatpush3.msra.mxu1 %v1112_v25  ;;  %v1338_v23 = vld [vmem:[#allocation8 + $0x2f8] sm:$0xff]  ;;  %p2658_p9 = scmp.lt.s32.totalorder %s2656_s18, %s2650_s28 }
 0x319   : > { %2220 = vmatpush3.msra.mxu0 %v1073_v27  ;;  %2179 = vmatprep.subr.mxu1 %v1127_v28 }
 0x31a   : > { %2221 = vmatprep.subr.mxu0 %v1088_v30  ;;  %2180 = vmatpush3.msra.mxu1 %v1111_v34  ;;  %p2659_p8 = por %p2658_p9, %p2657_p6 }
 0x31b   : > { %2222 = vmatpush3.msra.mxu0 %v1072_v33  ;;  %2181 = vmatprep.subr.mxu1 %v1126_v36 }
 0x31c   : > { %2223 = vmatprep.subr.mxu0 %v1087_v35  ;;  %2182 = vmatpush3.msra.mxu1 %v1110_v38  ;;  %v1094_v34 = vld [vmem:[#allocation2 + $0x18] sm:$0xfe]  ;;  %p2660_p11 = pnand %p2659_p8, %p2653_p7 }
 0x31d   : > { %2224 = vmatpush3.msra.mxu0 %v1071_v37  ;;  %2183 = vmatprep.subr.mxu1 %v1125_v24  ;;  %v1455_v35 = vld [vmem:[#allocation8 + $0x378] sm:$0xff]  ;;  %v1138_v38 = vrot.slane %v1094_v34, 1  ;;  %v1470_v24 = vld [vmem:[#allocation8 + $0x3f0] sm:$0xff]  ;;  %v1331_v34 = vld [vmem:[#allocation8 + $0x2c0] sm:$0xff] }
 0x31e   : > { %2225 = vmatprep.subr.mxu0 %v1086_v39  ;;  %2184 = vmatpush3.msra.mxu1 %v1109_v32  ;;  %v1058_v39 = vld [vmem:[#allocation2 + $0x18] sm:$0xff] }
 0x31f   : > { %2226 = vmatpush3.msra.mxu0 %v1070_v26  ;;  %2185 = vmatprep.subr.mxu1 %v1124_v44 }
 0x320   : > { %2227 = vmatprep.subr.mxu0 %v1085_v40  ;;  %2186 = vmatpush3.msra.mxu1 %v1108_v45  ;;  %v1454_v40 = vld [vmem:[#allocation8 + $0x370] sm:$0xff]  ;;  %v1453_v45 = vld [vmem:[#allocation8 + $0x368] sm:$0xff] }
 0x321   : > { %2228 = vmatpush3.msra.mxu0 %v1069_v41  ;;  %2187 = vmatprep.subr.mxu1 %v1123_v46 }
 0x322   : > { %2229 = vmatprep.subr.mxu0 %v1084_v42  ;;  %2188 = vmatpush3.msra.mxu1 %v1107_v47  ;;  %v1139_v42 = vrot.slane %v3053_v57, 1 }
 0x323   : > { %2230 = vmatpush3.msra.mxu0 %v1068_v43  ;;  %2189 = vmatprep.subr.mxu1 %v1122_v48  ;;  %v1469_v43 = vld [vmem:[#allocation8 + $0x3e8] sm:$0xff] }
 0x324   : > { %2231 = vmatprep.subr.mxu0 %v1083_v49  ;;  %2190 = vmatpush3.msra.mxu1 %v1106_v50  ;;  %v1140_v47 = vsel %vm1137_vm4, %v1138_v38, %v1139_v42  ;;  %v1468_v49 = vld [vmem:[#allocation8 + $0x3e0] sm:$0xff]  ;;  %v1322_v50 = vld [vmem:[#allocation8 + $0x278] sm:$0xff] }
 0x325   : > { %2232 = vmatpush3.msra.mxu0 %v1067_v51  ;;  %2191 = vmatprep.subr.mxu1 %v1121_v52  ;;  %v1096_v52 = vld [vmem:[#allocation2 + $0x8] sm:$0x1]  ;;  %v1459_v38 = vld [vmem:[#allocation8 + $0x398] sm:$0xff] }
 0x326   : > { %2233 = vmatprep.subr.mxu0 %v1082_v53  ;;  %2192 = vmatpush3.msra.mxu1 %v1105_v54  ;;  %v1452_v53 = vld [vmem:[#allocation8 + $0x360] sm:$0xff] }
 0x327   : > { %2234 = vmatpush3.msra.mxu0 %v1066_v55  ;;  %2193 = vmatprep.subr.mxu1 %v1120_v56  ;;  %v1467_v55 = vld [vmem:[#allocation8 + $0x3d8] sm:$0xff] }
 0x328   : > { %2235 = vmatprep.subr.mxu0 %v1081_v58  ;;  %2194 = vmatpush3.msra.mxu1 %v1104_v59  ;;  %v1337_v58 = vld [vmem:[#allocation8 + $0x2f0] sm:$0xff]  ;;  %v1451_v59 = vld [vmem:[#allocation8 + $0x358] sm:$0xff] }
 0x329   : > { %2236 = vmatpush3.msra.mxu0 %v1065_v0  ;;  %2195 = vmatprep.subr.mxu1 %v1119_v60  ;;  %v1321_v0 = vld [vmem:[#allocation8 + $0x270] sm:$0xff]  ;;  %v1144_v60 = vrot.slane %v1096_v52, 1  ;;  %v1311_v52 = vld [vmem:[#allocation8 + $0x220] sm:$0xff] }
 0x32a   : > { %2237 = vmatprep.subr.mxu0 %v1080_v61  ;;  %2196 = vmatpush3.msra.mxu1 %v1103_v62  ;;  %v1466_v62 = vld [vmem:[#allocation8 + $0x3d0] sm:$0xff] }
 0x32b   : > { %2238 = vmatpush3.msra.mxu0 %v1064_v63  ;;  %2197 = vmatprep.subr.mxu1 %v1118_v1  ;;  %v1336_v63 = vld [vmem:[#allocation8 + $0x2e8] sm:$0xff]  ;;  %v1450_v1 = vld [vmem:[#allocation8 + $0x350] sm:$0xff] }
 0x32c   : > { %2239 = vmatprep.subr.mxu0 %v1079_v4  ;;  %2198 = vmatpush3.msra.mxu1 %v1102_v5  ;;  %v1465_v4 = vld [vmem:[#allocation8 + $0x3c8] sm:$0xff] }
 0x32d   : > { %2240 = vmatpush3.msra.mxu0 %v1063_v6  ;;  %2199 = vmatprep.subr.mxu1 %v1117_v9  ;;  %v1320_v5 = vld [vmem:[#allocation8 + $0x268] sm:$0xff]  ;;  %v1335_v9 = vld [vmem:[#allocation8 + $0x2e0] sm:$0xff] }
 0x32e   : > { %2241 = vmatprep.subr.mxu0 %v1078_v7  ;;  %2200 = vmatpush3.msra.mxu1 %v1101_v11  ;;  %v1145_v7 = vsel %vm1137_vm4, %v1139_v42, %v1144_v60  ;;  %v1464_v11 = vld [vmem:[#allocation8 + $0x3c0] sm:$0xff]  ;;  %v1435_v42 = vld [vmem:[#allocation2 + $0x18] sm:$0xf8] }
 0x32f   : > { %2242 = vmatpush3.msra.mxu0 %v1062_v8  ;;  %v1449_v8 = vld [vmem:[#allocation8 + $0x348] sm:$0xff] }
 0x330   : > { %2287 = vmatprep.subr.mxu0 %v1471_v13  ;;  %v1448_v13 = vld [vmem:[#allocation8 + $0x340] sm:$0xff] }
 0x385   : > { %v1014_v14 = vpop.permute.xlu0 %1013 }
 0x386   : > { %v3058_v19 = vmax.f32 %v3045_v2, %v1014_v14  ;;  %v1116_v14 = vld [vmem:[#allocation8 + $0x188] sm:$0xff] }
 0x387   : > { %2201 = vmatprep.subr.mxu1 %v1116_v14 }
 0x388   : > { %1019 = vrot.lane.b32.xlu1 %v3058_v19, %s2732_s13  ;;  %2202 = vmatpush3.msra.mxu1 %v1100_v15  ;;  %v1334_v15 = vld [vmem:[#allocation8 + $0x2d8] sm:$0xff] }
 0x389   : > { %v1016_v29 = vpop.permute.xlu0 %1015  ;;  %2203 = vmatprep.subr.mxu1 %v1115_v16  ;;  %v1463_v16 = vld [vmem:[#allocation8 + $0x3b8] sm:$0xff] }
 0x38a   : > { %v3062_v31 = vmax.f32 %v3047_v3, %v1016_v29  ;;  %2204 = vmatpush3.msra.mxu1 %v1099_v20  ;;  %v1447_v20 = vld [vmem:[#allocation8 + $0x338] sm:$0xff] }
 0x38b   : > { %2249 = vmatprep.subr.mxu1 %v1338_v23  ;;  %v1462_v23 = vld [vmem:[#allocation8 + $0x3b0] sm:$0xff] }
 0x38c   : > { %1021 = vrot.lane.b32.xlu1 %v3062_v31, %s2732_s13 }
 0x3fa   : > { %v1020_v10 = vpop.permute.xlu1 %1019 }
 0x3fb   : > { %v1023_v12 = vmax.f32 %v3058_v19, %v1020_v10 }
 0x3fd   : > { %1025 = vrot.lane.b32.xlu0 %v1023_v12, %s2733_s16 }
 0x3fe   : > { %v1022_v17 = vpop.permute.xlu1 %1021 }
 0x3ff   : > { %v1024_v21 = vmax.f32 %v3062_v31, %v1022_v17  ;;  %v1318_v17 = vld [vmem:[#allocation8 + $0x258] sm:$0xff] }
 0x401   : > { %1027 = vrot.lane.b32.xlu1 %v1024_v21, %s2733_s16 }
 0x46f   : > { %v1026_v19 = vpop.permute.xlu0 %1025 }
 0x470   : > { %v1029_v25 = vmax.f32 %v1023_v12, %v1026_v19  ;;  %v1319_v12 = vld [vmem:[#allocation8 + $0x260] sm:$0xff]  ;;  %v1317_v19 = vld [vmem:[#allocation8 + $0x250] sm:$0xff] }
 0x472   : > { %v1049_v27 = vrot.slane %v1029_v25, 5  ;;  %v1446_v25 = vld [vmem:[#allocation8 + $0x330] sm:$0xff] }
 0x473   : > { %v1028_v28 = vpop.permute.xlu1 %1027 }
 0x474   : > { %1055 = vst [vmem:[#allocation2 + $0x20] sm:$0xf8] %v1049_v27  ;;  %v1030_v29 = vmax.f32 %v1024_v21, %v1028_v28  ;;  %v1333_v21 = vld [vmem:[#allocation8 + $0x2d0] sm:$0xff]  ;;  %v1461_v28 = vld [vmem:[#allocation8 + $0x3a8] sm:$0xff] }
 0x476   : > { %v1050_v30 = vrot.slane %v1030_v29, 5  ;;  %v1316_v29 = vld [vmem:[#allocation8 + $0x248] sm:$0xff] }
 0x478   : > { %v3068_v33 = vsel %vm1037_vm3, %v1049_v27, %v1050_v30  ;;  %1057 = vst [vmem:[#allocation2] sm:$0x7] %v1050_v30  ;;  %v1332_v27 = vld [vmem:[#allocation8 + $0x2c8] sm:$0xff] }
 0x479   : > { %v1142_v32 = vrot.slane %v3068_v33, 1  ;;  %v1481_v46 = vrot.slane %v3068_v33, 3  ;;  %v1348_v10 = vrot.slane %v3068_v33, 2  ;;  %v1445_v30 = vld [vmem:[#allocation8 + $0x328] sm:$0xff] }
 0x47b   : > { %v1059_v36 = vld [vmem:[#allocation2 + $0x20] sm:$0xff] }
 0x47c   : > { %v1095_v37 = vld [vmem:[#allocation2 + $0x20] sm:$0xfe]  ;;  %1291 = vmatprep.mubr.f32.mxu0 %v1059_v36 }
 0x47d   : > { %v1436_v31 = vld [vmem:[#allocation2 + $0x20] sm:$0xf8]  ;;  %v1141_v26 = vrot.slane %v1095_v37, 1  ;;  %1292 = vmatmul.mubr.f32.vlgmr.msra.gmra.mxu0 %v1058_v39  ;;  %v1314_v39 = vld [vmem:[#allocation8 + $0x238] sm:$0xff] }
 0x47e   : > { %v1480_v41 = vrot.slane %v1436_v31, 3  ;;  %2288 = vmatpush3.msra.mxu0 %v1455_v35  ;;  %1296 = vmatprep.mubr.f32.mxu0 %v3068_v33  ;;  %v1303_v61 = vld [vmem:[#allocation2 + $0x20] sm:$0xfc]  ;;  %v1330_v31 = vld [vmem:[#allocation8 + $0x2b8] sm:$0xff] }
 0x47f   : > { %v1143_v44 = vsel %vm1137_vm4, %v1141_v26, %v1142_v32  ;;  %2289 = vmatprep.subr.mxu0 %v1470_v24  ;;  %v1097_v48 = vld [vmem:[#allocation2] sm:$0x1]  ;;  %v1347_v6 = vrot.slane %v1303_v61, 2  ;;  %v1443_v24 = vld [vmem:[#allocation8 + $0x318] sm:$0xff]  ;;  %v1329_v26 = vld [vmem:[#allocation8 + $0x2b0] sm:$0xff] }
 0x480   : > { %1216 = vmatprep.mubr.f32.mxu1 %v1143_v44  ;;  %2290 = vmatpush3.msra.mxu0 %v1454_v40  ;;  %v1146_v51 = vrot.slane %v1097_v48, 1  ;;  %v1482_v54 = vsel %vm1476_vm5, %v1480_v41, %v1481_v46  ;;  %v1460_v35 = vld [vmem:[#allocation8 + $0x3a0] sm:$0xff]  ;;  %v1313_v40 = vld [vmem:[#allocation8 + $0x230] sm:$0xff]  ;;  %v1457_v44 = vld [vmem:[#allocation8 + $0x388] sm:$0xff] }
 0x481   : > { %1217 = vmatmul.mubr.f32.vlgmr.msra.gmra.mxu1 %v1140_v47  ;;  %2291 = vmatprep.subr.mxu0 %v1469_v43  ;;  %v1349_v14 = vsel %vm1343_vm6, %v1347_v6, %v1348_v10  ;;  %v1315_v36 = vld [vmem:[#allocation8 + $0x240] sm:$0xff]  ;;  %v1442_v41 = vld [vmem:[#allocation8 + $0x310] sm:$0xff]  ;;  %v1328_v43 = vld [vmem:[#allocation8 + $0x2a8] sm:$0xff] }
 0x482   : > { %1297 = vmatmul.mubr.f32.gmra.mxu0 %v3053_v57  ;;  %v1147_v56 = vsel %vm1137_vm4, %v1142_v32, %v1146_v51  ;;  %2250 = vmatpush3.msra.mxu1 %v1322_v50  ;;  %v1444_v37 = vld [vmem:[#allocation8 + $0x320] sm:$0xff]  ;;  %v1458_v32 = vld [vmem:[#allocation8 + $0x390] sm:$0xff]  ;;  %v1441_v47 = vld [vmem:[#allocation8 + $0x308] sm:$0xff]  ;;  %v1477_v51 = vrot.slane %v1435_v42, 3 }
 0x483   : > { %2292 = vmatpush3.msra.mxu0 %v1453_v45  ;;  %1555 = vmatprep.mubr.f32.mxu0 %v1482_v54  ;;  %v1312_v45 = vld [vmem:[#allocation8 + $0x228] sm:$0xff]  ;;  %v1438_v48 = vld [vmem:[#allocation2] sm:$0x7]  ;;  %v1326_v54 = vld [vmem:[#allocation8 + $0x298] sm:$0xff] }
 0x484   : > { %2293 = vmatprep.subr.mxu0 %v1468_v49  ;;  %1221 = vmatprep.mubr.f32.mxu1 %v1147_v56  ;;  %v1327_v49 = vld [vmem:[#allocation8 + $0x2a0] sm:$0xff]  ;;  %v1485_v56 = vrot.slane %v1438_v48, 3  ;;  %v1721_v61 = vld [vmem:[#allocation8 + $0x578] sm:$0xff]  ;;  %v1309_v6 = vld [vmem:[#allocation8 + $0x210] sm:$0xff] }
 0x485   : > { %2294 = vmatpush3.msra.mxu0 %v1452_v53  ;;  %2251 = vmatprep.subr.mxu1 %v1337_v58  ;;  %v1456_v50 = vld [vmem:[#allocation8 + $0x380] sm:$0xff]  ;;  %v1437_v58 = vld [vmem:[#allocation2 + $0x8] sm:$0x7] }
 0x486   : > { %2295 = vmatprep.subr.mxu0 %v1467_v55  ;;  %2252 = vmatpush3.msra.mxu1 %v1321_v0  ;;  %v1440_v53 = vld [vmem:[#allocation8 + $0x300] sm:$0xff]  ;;  %v1478_v55 = vrot.slane %v3053_v57, 3  ;;  %v1310_v0 = vld [vmem:[#allocation8 + $0x218] sm:$0xff] }
 0x487   : > { %2296 = vmatpush3.msra.mxu0 %v1451_v59  ;;  %2253 = vmatprep.subr.mxu1 %v1336_v63  ;;  %v1737_v59 = vld [vmem:[#allocation8 + $0x5f8] sm:$0xff]  ;;  %v1325_v63 = vld [vmem:[#allocation8 + $0x290] sm:$0xff]  ;;  %v1601_v48 = vld [vmem:[#allocation8 + $0x4e0] sm:$0xff] }
 0x488   : > { %2297 = vmatprep.subr.mxu0 %v1466_v62  ;;  %1222 = vmatmul.mubr.f32.gmra.mxu1 %v1145_v7  ;;  %v1479_v60 = vsel %vm1476_vm5, %v1477_v51, %v1478_v55  ;;  %v1702_v62 = vld [vmem:[#allocation2 + $0x20] sm:$0xe0]  ;;  %v1720_v7 = vld [vmem:[#allocation8 + $0x570] sm:$0xff] }
 0x489   : > { %2298 = vmatpush3.msra.mxu0 %v1450_v1  ;;  %2254 = vmatpush3.msra.mxu1 %v1320_v5  ;;  %v1736_v1 = vld [vmem:[#allocation8 + $0x5f0] sm:$0xff]  ;;  %v1486_v5 = vsel %vm1476_vm5, %v1481_v46, %v1485_v56  ;;  %v1323_v46 = vld [vmem:[#allocation8 + $0x280] sm:$0xff]  ;;  %v1713_v56 = vld [vmem:[#allocation8 + $0x538] sm:$0xff] }
 0x48a   : > { %2299 = vmatprep.subr.mxu0 %v1465_v4  ;;  %2255 = vmatprep.subr.mxu1 %v1335_v9  ;;  %v1483_v4 = vrot.slane %v1437_v58, 3  ;;  %v1745_v9 = vrot.slane %v1702_v62, 5  ;;  %v1585_v51 = vld [vmem:[#allocation8 + $0x460] sm:$0xff]  ;;  %v1599_v58 = vld [vmem:[#allocation8 + $0x4d0] sm:$0xff]  ;;  %v1727_v62 = vld [vmem:[#allocation8 + $0x5a8] sm:$0xff] }
 0x48b   : > { %2300 = vmatpush3.msra.mxu0 %v1449_v8  ;;  %1422 = vmatprep.mubr.f32.mxu1 %v1349_v14  ;;  %v1324_v8 = vld [vmem:[#allocation8 + $0x288] sm:$0xff]  ;;  %v1305_v14 = vld [vmem:[#allocation2] sm:$0x3] }
 0x48c   : > { %2301 = vmatprep.subr.mxu0 %v1464_v11  ;;  %2256 = vmatpush3.msra.mxu1 %v1319_v12  ;;  %v1302_v11 = vld [vmem:[#allocation2 + $0x18] sm:$0xfc]  ;;  %v1735_v12 = vld [vmem:[#allocation8 + $0x5e8] sm:$0xff] }
 0x48d   : > { %2302 = vmatpush3.msra.mxu0 %v1448_v13  ;;  %2257 = vmatprep.subr.mxu1 %v1334_v15  ;;  %v1308_v13 = vld [vmem:[#allocation8 + $0x208] sm:$0xff]  ;;  %v1484_v15 = vsel %vm1476_vm5, %v1478_v55, %v1483_v4  ;;  %v1584_v55 = vld [vmem:[#allocation8 + $0x458] sm:$0xff]  ;;  %v1597_v4 = vld [vmem:[#allocation8 + $0x4c0] sm:$0xff] }
 0x48e   : > { %2303 = vmatprep.subr.mxu0 %v1463_v16  ;;  %2258 = vmatpush3.msra.mxu1 %v1318_v17  ;;  %v1719_v16 = vld [vmem:[#allocation8 + $0x568] sm:$0xff]  ;;  %v1746_v17 = vrot.slane %v3068_v33, 5 }
 0x48f   : > { %2304 = vmatpush3.msra.mxu0 %v1447_v20  ;;  %2259 = vmatprep.subr.mxu1 %v1333_v21  ;;  %v1734_v20 = vld [vmem:[#allocation8 + $0x5e0] sm:$0xff]  ;;  %v1344_v21 = vrot.slane %v1302_v11, 2  ;;  %v1580_v11 = vld [vmem:[#allocation8 + $0x438] sm:$0xff] }
 0x490   : > { %2305 = vmatprep.subr.mxu0 %v1462_v23  ;;  %2260 = vmatpush3.msra.mxu1 %v1317_v19  ;;  %v1747_v23 = vsel %vm1037_vm3, %v1745_v9, %v1746_v17  ;;  %v1307_v19 = vld [vmem:[#allocation8 + $0x200] sm:$0xff]  ;;  %v1725_v9 = vld [vmem:[#allocation8 + $0x598] sm:$0xff] }
 0x491   : > { %2306 = vmatpush3.msra.mxu0 %v1446_v25  ;;  %2261 = vmatprep.subr.mxu1 %v1332_v27  ;;  %v1718_v25 = vld [vmem:[#allocation8 + $0x560] sm:$0xff]  ;;  %v1352_v27 = vrot.slane %v1305_v14, 2  ;;  %v1724_v14 = vld [vmem:[#allocation8 + $0x590] sm:$0xff] }
 0x492   : > { %2307 = vmatprep.subr.mxu0 %v1461_v28  ;;  %2262 = vmatpush3.msra.mxu1 %v1316_v29  ;;  %v1345_v28 = vrot.slane %v3053_v57, 2  ;;  %v1604_v29 = vld [vmem:[#allocation8 + $0x4f8] sm:$0xff] }
 0x493   : > { %2308 = vmatpush3.msra.mxu0 %v1445_v30  ;;  %2263 = vmatprep.subr.mxu1 %v1331_v34  ;;  %v1304_v30 = vld [vmem:[#allocation2 + $0x8] sm:$0x3]  ;;  %v1733_v34 = vld [vmem:[#allocation8 + $0x5d8] sm:$0xff] }
 0x494   : > { %2309 = vmatprep.subr.mxu0 %v1460_v35  ;;  %2264 = vmatpush3.msra.mxu1 %v1315_v36  ;;  %v1346_v35 = vsel %vm1343_vm6, %v1344_v21, %v1345_v28  ;;  %v1588_v36 = vld [vmem:[#allocation8 + $0x478] sm:$0xff]  ;;  %v1723_v21 = vld [vmem:[#allocation8 + $0x588] sm:$0xff] }
 0x495   : > { %2310 = vmatpush3.msra.mxu0 %v1444_v37  ;;  %2265 = vmatprep.subr.mxu1 %v1330_v31  ;;  %v1717_v37 = vld [vmem:[#allocation8 + $0x558] sm:$0xff]  ;;  %v1569_v31 = vld [vmem:[#allocation2 + $0x20] sm:$0xf0] }
 0x496   : > { %2311 = vmatprep.subr.mxu0 %v1459_v38  ;;  %2266 = vmatpush3.msra.mxu1 %v1314_v39  ;;  %v1353_v38 = vsel %vm1343_vm6, %v1348_v10, %v1352_v27  ;;  %v1603_v39 = vld [vmem:[#allocation8 + $0x4f0] sm:$0xff]  ;;  %v1613_v42 = vrot.slane %v1569_v31, 4  ;;  %v1614_v10 = vrot.slane %v3068_v33, 4  ;;  %v1593_v27 = vld [vmem:[#allocation8 + $0x4a0] sm:$0xff]  ;;  %v1743_v31 = vrot.slane %v3053_v57, 5 }
 0x497   : > { %2312 = vmatpush3.msra.mxu0 %v1443_v24  ;;  %2267 = vmatprep.subr.mxu1 %v1329_v26  ;;  %v1732_v24 = vld [vmem:[#allocation8 + $0x5d0] sm:$0xff]  ;;  %v1350_v26 = vrot.slane %v1304_v30, 2  ;;  %v1577_v30 = vld [vmem:[#allocation8 + $0x420] sm:$0xff] }
 0x498   : > { %2313 = vmatprep.subr.mxu0 %v1458_v32  ;;  %2268 = vmatpush3.msra.mxu1 %v1313_v40  ;;  %v1587_v32 = vld [vmem:[#allocation8 + $0x470] sm:$0xff] }
 0x499   : > { %2314 = vmatpush3.msra.mxu0 %v1442_v41  ;;  %2269 = vmatprep.subr.mxu1 %v1328_v43  ;;  %v1716_v40 = vld [vmem:[#allocation8 + $0x550] sm:$0xff]  ;;  %v1602_v41 = vld [vmem:[#allocation8 + $0x4e8] sm:$0xff] }
 0x49a   : > { %2315 = vmatprep.subr.mxu0 %v1457_v44  ;;  %2270 = vmatpush3.msra.mxu1 %v1312_v45  ;;  %v1731_v43 = vld [vmem:[#allocation8 + $0x5c8] sm:$0xff]  ;;  %v1351_v45 = vsel %vm1343_vm6, %v1345_v28, %v1350_v26  ;;  %v1722_v28 = vld [vmem:[#allocation8 + $0x580] sm:$0xff] }
 0x49b   : > { %2316 = vmatpush3.msra.mxu0 %v1441_v47  ;;  %2271 = vmatprep.subr.mxu1 %v1327_v49  ;;  %v1586_v44 = vld [vmem:[#allocation8 + $0x468] sm:$0xff]  ;;  %v1730_v49 = vld [vmem:[#allocation8 + $0x5c0] sm:$0xff] }
 0x49c   : > { %2317 = vmatprep.subr.mxu0 %v1456_v50  ;;  %2272 = vmatpush3.msra.mxu1 %v1311_v52  ;;  %v1715_v47 = vld [vmem:[#allocation8 + $0x548] sm:$0xff]  ;;  %v1615_v50 = vsel %vm1609_vm7, %v1613_v42, %v1614_v10  ;;  %v1714_v52 = vld [vmem:[#allocation8 + $0x540] sm:$0xff] }
 0x49d   : > { %2318 = vmatpush3.msra.mxu0 %v1440_v53  ;;  %2273 = vmatprep.subr.mxu1 %v1326_v54  ;;  %v1600_v53 = vld [vmem:[#allocation8 + $0x4d8] sm:$0xff]  ;;  %v1590_v42 = vld [vmem:[#allocation8 + $0x488] sm:$0xff] }
 0x49e   : > { %1556 = vmatmul.mubr.f32.vlgmr.msra.gmra.mxu0 %v1479_v60  ;;  %2363 = vmatprep.subr.mxu0 %v1737_v59  ;;  %v1729_v54 = vld [vmem:[#allocation8 + $0x5b8] sm:$0xff]  ;;  %v1728_v59 = vld [vmem:[#allocation8 + $0x5b0] sm:$0xff] }
 0x49f   : > { %2274 = vmatpush3.msra.mxu1 %v1310_v0  ;;  %1560 = vmatprep.mubr.f32.mxu0 %v1486_v5  ;;  %v1583_v0 = vld [vmem:[#allocation8 + $0x450] sm:$0xff]  ;;  %v1726_v5 = vld [vmem:[#allocation8 + $0x5a0] sm:$0xff] }
 0x4a0   : > { %2364 = vmatpush3.msra.mxu0 %v1721_v61  ;;  %2275 = vmatprep.subr.mxu1 %v1325_v63  ;;  %v1712_v60 = vld [vmem:[#allocation8 + $0x530] sm:$0xff]  ;;  %v1598_v61 = vld [vmem:[#allocation8 + $0x4c8] sm:$0xff] }
 0x4a1   : > { %2365 = vmatprep.subr.mxu0 %v1736_v1  ;;  %2276 = vmatpush3.msra.mxu1 %v1309_v6  ;;  %v1582_v63 = vld [vmem:[#allocation8 + $0x448] sm:$0xff]  ;;  %v1581_v6 = vld [vmem:[#allocation8 + $0x440] sm:$0xff] }
 0x4a2   : > { %2366 = vmatpush3.msra.mxu0 %v1720_v7  ;;  %2277 = vmatprep.subr.mxu1 %v1324_v8  ;;  %v1711_v1 = vld [vmem:[#allocation8 + $0x528] sm:$0xff]  ;;  %v1710_v7 = vld [vmem:[#allocation8 + $0x520] sm:$0xff]  ;;  %v1596_v8 = vld [vmem:[#allocation8 + $0x4b8] sm:$0xff] }
 0x4a3   : > { %1561 = vmatmul.mubr.f32.gmra.mxu0 %v1484_v15  ;;  %2367 = vmatprep.subr.mxu0 %v1735_v12  ;;  %v1709_v12 = vld [vmem:[#allocation8 + $0x518] sm:$0xff]  ;;  %v1579_v15 = vld [vmem:[#allocation8 + $0x430] sm:$0xff] }
 0x4a4   : > { %2278 = vmatpush3.msra.mxu1 %v1308_v13  ;;  %2368 = vmatpush3.msra.mxu0 %v1719_v16  ;;  %v1595_v13 = vld [vmem:[#allocation8 + $0x4b0] sm:$0xff] }
 0x4a5   : > { %1820 = vmatprep.mubr.f32.mxu0 %v1747_v23  ;;  %2279 = vmatprep.subr.mxu1 %v1323_v46  ;;  %v1708_v16 = vld [vmem:[#allocation8 + $0x510] sm:$0xff]  ;;  %v1701_v46 = vld [vmem:[#allocation2 + $0x18] sm:$0xe0]  ;;  %v1704_v23 = vld [vmem:[#allocation2] sm:$0x1f] }
 0x4a6   : > { %2369 = vmatprep.subr.mxu0 %v1734_v20  ;;  %2280 = vmatpush3.msra.mxu1 %v1307_v19  ;;  %v1594_v20 = vld [vmem:[#allocation8 + $0x4a8] sm:$0xff] }
 0x4a7   : > { %2370 = vmatpush3.msra.mxu0 %v1718_v25  ;;  %1423 = vmatmul.mubr.f32.vlgmr.msra.gmra.mxu1 %v1346_v35  ;;  %v1578_v19 = vld [vmem:[#allocation8 + $0x428] sm:$0xff]  ;;  %v1750_v35 = vrot.slane %v1704_v23, 5  ;;  %v1858_v23 = vld [vmem:[#allocation8 + $0x6a0] sm:$0xff] }
 0x4a8   : > { %2325 = vmatprep.subr.mxu1 %v1604_v29  ;;  %2371 = vmatprep.subr.mxu0 %v1733_v34  ;;  %v1707_v25 = vld [vmem:[#allocation8 + $0x508] sm:$0xff]  ;;  %v1742_v29 = vrot.slane %v1701_v46, 5  ;;  %v1706_v34 = vld [vmem:[#allocation8 + $0x500] sm:$0xff]  ;;  %v1844_v46 = vld [vmem:[#allocation8 + $0x630] sm:$0xff] }
 0x4a9   : > { %1427 = vmatprep.mubr.f32.mxu1 %v1353_v38  ;;  %2326 = vmatpush3.msra.mxu1 %v1588_v36  ;;  %v1703_v36 = vld [vmem:[#allocation2 + $0x8] sm:$0x1f]  ;;  %v1576_v38 = vld [vmem:[#allocation8 + $0x418] sm:$0xff] }
 0x4aa   : > { %2372 = vmatpush3.msra.mxu0 %v1717_v37  ;;  %2327 = vmatprep.subr.mxu1 %v1603_v39  ;;  %v1592_v37 = vld [vmem:[#allocation8 + $0x498] sm:$0xff]  ;;  %v1744_v39 = vsel %vm1037_vm3, %v1742_v29, %v1743_v31  ;;  %v1748_v26 = vrot.slane %v1703_v36, 5  ;;  %v1840_v29 = vld [vmem:[#allocation8 + $0x610] sm:$0xff]  ;;  %v1839_v36 = vld [vmem:[#allocation8 + $0x608] sm:$0xff] }
 0x4ab   : > { %2373 = vmatprep.subr.mxu0 %v1732_v24  ;;  %2328 = vmatpush3.msra.mxu1 %v1587_v32  ;;  %v1591_v24 = vld [vmem:[#allocation8 + $0x490] sm:$0xff]  ;;  %v1751_v32 = vsel %vm1037_vm3, %v1746_v17, %v1750_v35  ;;  %v1611_v17 = vrot.slane %v3053_v57, 4  ;;  %v1867_v57 = vld [vmem:[#allocation8 + $0x6e8] sm:$0xff]  ;;  %v1836_v35 = vld [vmem:[#allocation2] sm:$0x3f] }
 0x4ac   : > { %2374 = vmatpush3.msra.mxu0 %v1716_v40  ;;  %1428 = vmatmul.mubr.f32.gmra.mxu1 %v1351_v45  ;;  %v1575_v40 = vld [vmem:[#allocation8 + $0x410] sm:$0xff]  ;;  %v1749_v45 = vsel %vm1037_vm3, %v1743_v31, %v1748_v26  ;;  %v2571_v26 = vld [vmem:[#allocation2 + $0x28] sm:$0xff] }
 0x4ad   : > { %2329 = vmatprep.subr.mxu1 %v1602_v41  ;;  %2375 = vmatprep.subr.mxu0 %v1731_v43  ;;  %v1568_v41 = vld [vmem:[#allocation2 + $0x18] sm:$0xf0]  ;;  %v1571_v43 = vld [vmem:[#allocation2] sm:$0xf] }
 0x4ae   : > { %2330 = vmatpush3.msra.mxu1 %v1586_v44  ;;  %1688 = vmatprep.mubr.f32.mxu1 %v1615_v50  ;;  %v1574_v44 = vld [vmem:[#allocation8 + $0x408] sm:$0xff]  ;;  %v1618_v50 = vrot.slane %v1571_v43, 4 }
 0x4af   : > { %2376 = vmatpush3.msra.mxu0 %v1715_v47  ;;  %2331 = vmatprep.subr.mxu1 %v1601_v48  ;;  %v1589_v47 = vld [vmem:[#allocation8 + $0x480] sm:$0xff]  ;;  %v1610_v48 = vrot.slane %v1568_v41, 4 }
 0x4b0   : > { %2377 = vmatprep.subr.mxu0 %v1730_v49  ;;  %2332 = vmatpush3.msra.mxu1 %v1585_v51  ;;  %v1573_v49 = vld [vmem:[#allocation8 + $0x400] sm:$0xff]  ;;  %v1570_v51 = vld [vmem:[#allocation2 + $0x8] sm:$0xf] }
 0x4b1   : > { %2378 = vmatpush3.msra.mxu0 %v1714_v52  ;;  %2333 = vmatprep.subr.mxu1 %v1600_v53  ;;  %v1869_v52 = vld [vmem:[#allocation8 + $0x6f8] sm:$0xff]  ;;  %v1834_v53 = vld [vmem:[#allocation2 + $0x20] sm:$0xc0] }
 0x4b2   : > { %2379 = vmatprep.subr.mxu0 %v1729_v54  ;;  %2334 = vmatpush3.msra.mxu1 %v1584_v55  ;;  %v1853_v54 = vld [vmem:[#allocation8 + $0x678] sm:$0xff]  ;;  %v1612_v55 = vsel %vm1609_vm7, %v1610_v48, %v1611_v17 }
 0x4b3   : > { %2380 = vmatpush3.msra.mxu0 %v1713_v56  ;;  %2335 = vmatprep.subr.mxu1 %v1599_v58  ;;  %v1868_v56 = vld [vmem:[#allocation8 + $0x6f0] sm:$0xff]  ;;  %v1616_v58 = vrot.slane %v1570_v51, 4 }
 0x4b4   : > { %2381 = vmatprep.subr.mxu0 %v1728_v59  ;;  %2336 = vmatpush3.msra.mxu1 %v1583_v0  ;;  %v1619_v59 = vsel %vm1609_vm7, %v1614_v10, %v1618_v50  ;;  %v1852_v0 = vld [vmem:[#allocation8 + $0x670] sm:$0xff] }
 0x4b5   : > { %2382 = vmatpush3.msra.mxu0 %v1712_v60  ;;  %2337 = vmatprep.subr.mxu1 %v1598_v61  ;;  %v1878_v60 = vrot.slane %v1834_v53, 6  ;;  %v1851_v61 = vld [vmem:[#allocation8 + $0x668] sm:$0xff] }
 0x4b6   : > { %2383 = vmatprep.subr.mxu0 %v1727_v62  ;;  %2338 = vmatpush3.msra.mxu1 %v1582_v63  ;;  %v1879_v62 = vrot.slane %v3068_v33, 6  ;;  %v1617_v63 = vsel %vm1609_vm7, %v1611_v17, %v1616_v58 }
 0x4b7   : > { %2384 = vmatpush3.msra.mxu0 %v1711_v1  ;;  %2339 = vmatprep.subr.mxu1 %v1597_v4  ;;  %v1866_v1 = vld [vmem:[#allocation8 + $0x6e0] sm:$0xff] }
 0x4b8   : > { %2385 = vmatprep.subr.mxu0 %v1726_v5  ;;  %2340 = vmatpush3.msra.mxu1 %v1581_v6  ;;  %v1880_v10 = vsel %vm1874_vm8, %v1878_v60, %v1879_v62  ;;  %v1850_v4 = vld [vmem:[#allocation8 + $0x660] sm:$0xff]  ;;  %v1865_v5 = vld [vmem:[#allocation8 + $0x6d8] sm:$0xff] }
 0x4b9   : > { %2386 = vmatpush3.msra.mxu0 %v1710_v7  ;;  %2341 = vmatprep.subr.mxu1 %v1596_v8  ;;  %v1849_v6 = vld [vmem:[#allocation8 + $0x658] sm:$0xff]  ;;  %v1864_v7 = vld [vmem:[#allocation8 + $0x6d0] sm:$0xff] }
 0x4ba   : > { %2387 = vmatprep.subr.mxu0 %v1725_v9  ;;  %2342 = vmatpush3.msra.mxu1 %v1580_v11  ;;  %v1848_v8 = vld [vmem:[#allocation8 + $0x650] sm:$0xff]  ;;  %v1863_v9 = vld [vmem:[#allocation8 + $0x6c8] sm:$0xff] }
 0x4bb   : > { %2388 = vmatpush3.msra.mxu0 %v1709_v12  ;;  %2343 = vmatprep.subr.mxu1 %v1595_v13  ;;  %v1847_v11 = vld [vmem:[#allocation8 + $0x648] sm:$0xff]  ;;  %v1862_v12 = vld [vmem:[#allocation8 + $0x6c0] sm:$0xff] }
 0x4bc   : > { %2389 = vmatprep.subr.mxu0 %v1724_v14  ;;  %2344 = vmatpush3.msra.mxu1 %v1579_v15  ;;  %v1846_v13 = vld [vmem:[#allocation8 + $0x640] sm:$0xff]  ;;  %v1861_v14 = vld [vmem:[#allocation8 + $0x6b8] sm:$0xff] }
 0x4bd   : > { %2390 = vmatpush3.msra.mxu0 %v1708_v16  ;;  %2345 = vmatprep.subr.mxu1 %v1594_v20  ;;  %v1845_v15 = vld [vmem:[#allocation8 + $0x638] sm:$0xff]  ;;  %v1860_v16 = vld [vmem:[#allocation8 + $0x6b0] sm:$0xff]  ;;  %v1859_v20 = vld [vmem:[#allocation8 + $0x6a8] sm:$0xff] }
 0x4be   : > { %2391 = vmatprep.subr.mxu0 %v1723_v21  ;;  %2346 = vmatpush3.msra.mxu1 %v1578_v19  ;;  %v1843_v21 = vld [vmem:[#allocation8 + $0x628] sm:$0xff]  ;;  %v1842_v19 = vld [vmem:[#allocation8 + $0x620] sm:$0xff] }
 0x4bf   : > { %2392 = vmatpush3.msra.mxu0 %v1707_v25  ;;  %2347 = vmatprep.subr.mxu1 %v1593_v27  ;;  %v1857_v25 = vld [vmem:[#allocation8 + $0x698] sm:$0xff] }
 0x4c0   : > { %2393 = vmatprep.subr.mxu0 %v1722_v28  ;;  %2348 = vmatpush3.msra.mxu1 %v1577_v30  ;;  %v1841_v27 = vld [vmem:[#allocation8 + $0x618] sm:$0xff]  ;;  %v1856_v28 = vld [vmem:[#allocation8 + $0x690] sm:$0xff] }
 0x4c1   : > { %2394 = vmatpush3.msra.mxu0 %v1706_v34  ;;  %2349 = vmatprep.subr.mxu1 %v1592_v37  ;;  %v1833_v30 = vld [vmem:[#allocation2 + $0x18] sm:$0xc0]  ;;  %v1855_v34 = vld [vmem:[#allocation8 + $0x688] sm:$0xff]  ;;  %v1854_v37 = vld [vmem:[#allocation8 + $0x680] sm:$0xff] }
 0x4c2   : > { %1821 = vmatmul.mubr.f32.vlgmr.msra.gmra.mxu0 %v1744_v39  ;;  %2350 = vmatpush3.msra.mxu1 %v1576_v38  ;;  %v1875_v31 = vrot.slane %v1833_v30, 6  ;;  %v1838_v38 = vld [vmem:[#allocation8 + $0x600] sm:$0xff]  ;;  %v1883_v39 = vrot.slane %v1836_v35, 6 }
 0x4c3   : > { %1825 = vmatprep.mubr.f32.mxu0 %v1751_v32  ;;  %2351 = vmatprep.subr.mxu1 %v1591_v24  ;;  %v1835_v24 = vld [vmem:[#allocation2 + $0x8] sm:$0x3f]  ;;  %v1876_v32 = vrot.slane %v2571_v26, 6 }
 0x4c4   : > { %2352 = vmatpush3.msra.mxu1 %v1575_v40  ;;  %v1881_v41 = vrot.slane %v1835_v24, 6 }
 0x4c5   : > { %2353 = vmatprep.subr.mxu1 %v1590_v42  ;;  %v1877_v40 = vsel %vm1874_vm8, %v1875_v31, %v1876_v32  ;;  %v1884_v42 = vsel %vm1874_vm8, %v1879_v62, %v1883_v39 }
 0x4c6   : > { %1826 = vmatmul.mubr.f32.gmra.mxu0 %v1749_v45  ;;  %2354 = vmatpush3.msra.mxu1 %v1574_v44  ;;  %v1882_v43 = vsel %vm1874_vm8, %v1876_v32, %v1881_v41 }
 0x4c7   : > { %2355 = vmatprep.subr.mxu1 %v1589_v47 }
 0x4c8   : > { %2356 = vmatpush3.msra.mxu1 %v1573_v49 }
 0x4c9   : > { %1689 = vmatmul.mubr.f32.vlgmr.msra.gmra.mxu1 %v1612_v55  ;;  %2401 = vmatprep.subr.mxu1 %v1869_v52 }
 0x4ca   : > { %1693 = vmatprep.mubr.f32.mxu1 %v1619_v59  ;;  %2402 = vmatpush3.msra.mxu1 %v1853_v54 }
 0x4cb   : > { %2403 = vmatprep.subr.mxu1 %v1868_v56 }
 0x4cc   : > { %2404 = vmatpush3.msra.mxu1 %v1852_v0 }
 0x4cd   : > { %1694 = vmatmul.mubr.f32.gmra.mxu1 %v1617_v63  ;;  %2405 = vmatprep.subr.mxu1 %v1867_v57 }
 0x4ce   : > { %2406 = vmatpush3.msra.mxu1 %v1851_v61  ;;  %1953 = vmatprep.mubr.f32.mxu1 %v1880_v10 }
 0x4cf   : > { %2407 = vmatprep.subr.mxu1 %v1866_v1 }
 0x4d0   : > { %2408 = vmatpush3.msra.mxu1 %v1850_v4 }
 0x4d1   : > { %2409 = vmatprep.subr.mxu1 %v1865_v5 }
 0x4d2   : > { %2410 = vmatpush3.msra.mxu1 %v1849_v6 }
 0x4d3   : > { %2411 = vmatprep.subr.mxu1 %v1864_v7 }
 0x4d4   : > { %2412 = vmatpush3.msra.mxu1 %v1848_v8 }
 0x4d5   : > { %2413 = vmatprep.subr.mxu1 %v1863_v9 }
 0x4d6   : > { %2414 = vmatpush3.msra.mxu1 %v1847_v11 }
 0x4d7   : > { %2415 = vmatprep.subr.mxu1 %v1862_v12 }
 0x4d8   : > { %2416 = vmatpush3.msra.mxu1 %v1846_v13 }
 0x4d9   : > { %2417 = vmatprep.subr.mxu1 %v1861_v14 }
 0x4da   : > { %2418 = vmatpush3.msra.mxu1 %v1845_v15 }
 0x4db   : > { %2419 = vmatprep.subr.mxu1 %v1860_v16 }
 0x4dc   : > { %2420 = vmatpush3.msra.mxu1 %v1844_v46 }
 0x4dd   : > { %2421 = vmatprep.subr.mxu1 %v1859_v20 }
 0x4de   : > { %2422 = vmatpush3.msra.mxu1 %v1843_v21 }
 0x4df   : > { %2423 = vmatprep.subr.mxu1 %v1858_v23 }
 0x4e0   : > { %2424 = vmatpush3.msra.mxu1 %v1842_v19 }
 0x4e1   : > { %2425 = vmatprep.subr.mxu1 %v1857_v25 }
 0x4e2   : > { %2426 = vmatpush3.msra.mxu1 %v1841_v27 }
 0x4e3   : > { %2427 = vmatprep.subr.mxu1 %v1856_v28 }
 0x4e4   : > { %2428 = vmatpush3.msra.mxu1 %v1840_v29 }
 0x4e5   : > { %2429 = vmatprep.subr.mxu1 %v1855_v34 }
 0x4e6   : > { %2430 = vmatpush3.msra.mxu1 %v1839_v36 }
 0x4e7   : > { %2431 = vmatprep.subr.mxu1 %v1854_v37 }
 0x4e8   : > { %2432 = vmatpush3.msra.mxu1 %v1838_v38 }
 0x4e9   : > { %1954 = vmatmul.mubr.f32.vlgmr.msra.gmra.mxu1 %v1877_v40 }
 0x4ea   : > { %1958 = vmatprep.mubr.f32.mxu1 %v1884_v42 }
 0x4ed   : > { %1959 = vmatmul.mubr.f32.gmra.mxu1 %v1882_v43 }
 0x53d   : > { %v2243_v47 = vpop.f32.mrf.mxu0 }
 0x53f   : > { %v2244_v49 = vpop.f32.mrf.mxu0 }
 0x540   : > { %v2245_v61 = vadd.f32 %v2244_v49, %v2243_v47 }
 0x541   : > { %v2205_v44 = vpop.f32.mrf.mxu1 }
 0x542   : > { %v2246_v51 = vpop.f32.mrf.mxu0 }
 0x543   : > { %v2206_v45 = vpop.f32.mrf.mxu1 }
 0x544   : > { %v2247_v52 = vpop.f32.mrf.mxu0  ;;  %v2207_v0 = vadd.f32 %v2206_v45, %v2205_v44 }
 0x545   : > { %v2248_v5 = vadd.f32 %v2247_v52, %v2246_v51 }
 0x546   : > { %v1294_v1 = vadd.f32 %v2245_v61, %v2207_v0 }
 0x548   : > { %v2208_v48 = vpop.f32.mrf.mxu1 }
 0x54a   : > { %v2209_v50 = vpop.f32.mrf.mxu1 }
 0x54b   : > { %v2210_v10 = vadd.f32 %v2209_v50, %v2208_v48 }
 0x54d   : > { %v1299_v9 = vadd.f32 %v2248_v5, %v2210_v10 }
 0x55e   : > { %v2319_v54 = vpop.f32.mrf.mxu0 }
 0x560   : > { %v2320_v56 = vpop.f32.mrf.mxu0 }
 0x561   : > { %v2321_v11 = vadd.f32 %v2320_v56, %v2319_v54 }
 0x563   : > { %v2322_v58 = vpop.f32.mrf.mxu0 }
 0x565   : > { %v2323_v60 = vpop.f32.mrf.mxu0 }
 0x566   : > { %v2324_v46 = vadd.f32 %v2323_v60, %v2322_v58 }
 0x567   : > { %v2281_v17 = vpop.f32.mrf.mxu1 }
 0x569   : > { %v2282_v53 = vpop.f32.mrf.mxu1 }
 0x56a   : > { %v2283_v62 = vadd.f32 %v2282_v53, %v2281_v17 }
 0x56c   : > { %v2284_v55 = vpop.f32.mrf.mxu1  ;;  %v1433_v6 = vadd.f32 %v2283_v62, %v1294_v1 }
 0x56e   : > { %v2285_v33 = vpop.f32.mrf.mxu1  ;;  %v1566_v15 = vadd.f32 %v2321_v11, %v1433_v6 }
 0x56f   : > { %v2286_v7 = vadd.f32 %v2285_v33, %v2284_v55 }
 0x571   : > { %v1434_v14 = vadd.f32 %v2286_v7, %v1299_v9 }
 0x573   : > { %v1567_v25 = vadd.f32 %v2324_v46, %v1434_v14 }
 0x582   : > { %v2395_v63 = vpop.f32.mrf.mxu0 }
 0x584   : > { %v2396_v8 = vpop.f32.mrf.mxu0 }
 0x585   : > { %v2397_v19 = vadd.f32 %v2396_v8, %v2395_v63 }
 0x586   : > { %v2398_v16 = vpop.f32.mrf.mxu0 }
 0x588   : > { %v2399_v27 = vpop.f32.mrf.mxu0 }
 0x589   : > { %v2357_v59 = vpop.f32.mrf.mxu1  ;;  %v2400_v36 = vadd.f32 %v2399_v27, %v2398_v16 }
 0x58b   : > { %v2358_v57 = vpop.f32.mrf.mxu1 }
 0x58c   : > { %v2359_v12 = vadd.f32 %v2358_v57, %v2357_v59 }
 0x58d   : > { %v2360_v4 = vpop.f32.mrf.mxu1 }
 0x58e   : > { %v1699_v20 = vadd.f32 %v2359_v12, %v1566_v15 }
 0x58f   : > { %v2361_v13 = vpop.f32.mrf.mxu1 }
 0x590   : > { %v2362_v21 = vadd.f32 %v2361_v13, %v2360_v4  ;;  %v1831_v30 = vadd.f32 %v2397_v19, %v1699_v20 }
 0x592   : > { %v1700_v29 = vadd.f32 %v2362_v21, %v1567_v25 }
 0x594   : > { %v1832_v39 = vadd.f32 %v2400_v36, %v1700_v29 }
 0x5a9   : > { %v2433_v23 = vpop.f32.mrf.mxu1 }
 0x5ab   : > { %v2434_v28 = vpop.f32.mrf.mxu1 }
 0x5ac   : > { %v2435_v34 = vadd.f32 %v2434_v28, %v2433_v23 }
 0x5ad   : > { %v2436_v35 = vpop.f32.mrf.mxu1 }
 0x5ae   : > { %v1964_v37 = vadd.f32 %v2435_v34, %v1831_v30 }
 0x5af   : > { %v2437_v31 = vpop.f32.mrf.mxu1 }
 0x5b0   : > { %v1966_v38 = vsub.f32 0.0, %v1964_v37  ;;  %v2438_v24 = vadd.f32 %v2437_v31, %v2436_v35 }
 0x5b2   : > { %v1968_v26 = vmul.f32 1.442695, %v1966_v38  ;;  %v1965_v32 = vadd.f32 %v2438_v24, %v1832_v39 }
 0x5b4   : > { %2563 = vpow2.f32 %v1968_v26  ;;  %v1967_v40 = vsub.f32 0.0, %v1965_v32 }
 0x5b6   : > { %v1970_v41 = vmul.f32 1.442695, %v1967_v40 }
 0x5b8   : > { %2565 = vpow2.f32 %v1970_v41 }
 0x5c1   : > { %v2564_v42 = vpop.eup %2563 }
 0x5c2   : > { %v1972_v43 = vadd.f32 1.0, %v2564_v42 }
 0x5c4   : > { %2567 = vrcp.f32 %v1972_v43 }
 0x5c5   : > { %v2566_v44 = vpop.eup %2565 }
 0x5c6   : > { %v1973_v45 = vadd.f32 1.0, %v2566_v44 }
 0x5c8   : > { %2569 = vrcp.f32 %v1973_v45 }
 0x5d1   : > { %v2568_v47 = vpop.eup %2567 }
 0x5d2   : > { %v1978_v48 = vmul.f32 %v2568_v47, %v3045_v2 }
 0x5d4   : > { %v1980_v49 = vadd.f32 %v1978_v48, %v3033_v18 }
 0x5d5   : > { %v2570_v50 = vpop.eup %2569 }
 0x5d6   : > { %v1979_v51 = vmul.f32 %v2570_v50, %v3047_v3  ;;  %v1982_v17 = vmax.f32 %v1980_v49, 0.0 }
 0x5d8   : > { %v1981_v52 = vadd.f32 %v1979_v51, %v3035_v22  ;;  %1984 = vst [vmem:[%s315_s14] sm:$0xff] %v1982_v17 }
 0x5da   : > { %v1983_v18 = vmax.f32 %v1981_v52, 0.0 }
 0x5dc   : > { %1985 = vst [vmem:[%s315_s14 + $0x8] sm:$0xff] %v1983_v18 }
 0x5dd   : > { %2663 = shalt.err (!%p2660_p11)
}
 0x5de   : > { %s2664_s13 = scalar_lea.hbm %s3136_s20, 256  ;;  %s2668_s8 = scalar_lea.hbm %s3187_s7, 512 }
 0x5df   : > { %p2665_p0 = scmp.ne.s32.totalorder %s3136_s20, %s2664_s13  ;;  %p2669_p3 = scmp.lt.s32.totalorder %s3136_s20, %s3187_s7 }
 0x5e0   : > { %p2670_p2 = scmp.lt.s32.totalorder %s2668_s8, %s2664_s13 }
 0x5e1   : > { %p2666_p1 = pnand %p2665_p0, %p2815_p5 }
 0x5e2   : > { %p2671_p10 = por %p2670_p2, %p2669_p3 }
 0x5e3   : > { %p2667_p13 = pneg %p2666_p1 }
 0x5e5   : > { %p2672_p12 = pnand %p2671_p10, %p2667_p13 }
 0x5e7   : > { %2675 = shalt.err (!%p2672_p12)
}
 0x5e8   : > { %s2735_s15 = smov 128   ;;  %s2736_s19 = smov 8  }
 0x5e9   : > { %2486 = dma.vmem_to_hbm [thread:$0]  (%p2815_p5), %s3138_s17, 256, %s3136_s20, %s3140_s21, %s2735_s15, %s2735_s15, %s2736_s19  }
 0x5ea PF: > { %p2508_p4 = scmp.ge.s32.totalorder %s2718_s27, 2  ;;  %s2015_s28 = sand.u32 1, %s2706_s24  }
 0x5eb   : > { %p3197_p7 = scmp.ne.s32.totalorder %s3190_s12, 0  ;;  %s2016_s22 = scalar_lea.sflag [#allocation5], %s2015_s28 }
 0x5ed   : > { %p2499_p6 = pnand %p2508_p4, %p3197_p7 }
 0x5ef   : > { %p2500_p9 = pneg %p2499_p6 }
 0x5f1   : > { %2701 = dma.done.wait (%p2500_p9), %s2016_s22, 256  }
 0x5f2   : > { %2703 = vsyncadd (%p2500_p9), %s2016_s22, 4294967040  ;;  %p19_p8 = scmp.ge.s32.totalorder %s2802_s30, 4   ;;  %s3198_s24 = smov %s2710_s25 }
 0x5f3   : > { %s3199_s25 = smov %s2714_s26  ;;  %s3200_s26 = smov %s2813_s10 }
 0x5f4   : > { %s3201_s27 = smov %s2802_s30  ;;  %21 = sbr.rel (!%p19_p8) target bundleno = 5 (0x5), region = 102 }
 0x5f9   :  { %2021 = vsyncpa [#allocation4], 1 }
 0x5fa   :  { %2023 = vsyncpa [#allocation4 + $0x1], 1 }
 0x5fb   :  { %2024 = vsyncpa [#allocation7], 1 }
 0x5fc   :  { %2025 = vsyncpa [#allocation5], 1 }
 0x5fd   :  { %2027 = vsyncpa [#allocation5 + $0x1], 1 }

</bundles_post_ra>
